<compile_context>
chip_gen: v5e
topology: v5e:2x2
jax: 0.10.0
libtpu: 0.0.40
codegen_flags: <defaults>
</compile_context>

<pallas_src>
import functools

import jax
import jax.numpy as jnp
from jax import lax
from jax.experimental import pallas as pl
from jax.experimental.pallas import tpu as pltpu

CHUNK = 8  # scan chunk size == one sublane tile


# ----------------------------------------------------------------------------
# Pallas kernel: CobraBlock forward for TB batch elements (rows = TB*L).
# ----------------------------------------------------------------------------
def cobra_block_kernel(
    x_ref,        # (TBL, D) bf16 input tokens (skip connection source)
    wp_ref,       # (D, D)   mm   shared nn.Linear weight (y = x @ W + b)
    bp_ref,       # (1, D)   f32
    w0_ref,       # (L, L)   mm   conv tap for x[d-1]
    w1_ref,       # (L, L)   mm   conv tap for x[d]
    w2_ref,       # (L, L)   mm   conv tap for x[d+1]
    bconv_ref,    # (L, 1)   f32
    wdl_ref,      # (D, R)   mm   deltaBC -> delta (low rank)
    wb_ref,       # (D, N)   mm   deltaBC -> B
    wc_ref,       # (D, N)   mm   deltaBC -> C
    wdt_ref,      # (R, D)   mm   dt_proj weight
    bdt_ref,      # (1, D)   f32  dt_proj bias
    nega_ref,     # (N, D)   f32  -exp(A_log)^T   (hoisted to the wrapper)
    dpar_ref,     # (1, D)   f32  D parameter
    out_ref,      # (TBL, D) bf16
    x2_s,         # VMEM (TBL, D) f32  silu(proj(x))  (gate branch)
    x1_s,         # VMEM (TBL, D) f32  silu(conv(proj(x)))  (SSM input)
    delta_s,      # VMEM (TBL, D) f32
    dx_s,         # VMEM (TBL, D) f32  delta * x1
    b_s,          # VMEM (TBL, N) f32
    c_s,          # VMEM (TBL, N) f32
    h_s,          # VMEM (N, D)   f32  scan state
    y_s,          # VMEM (TBL, D) f32  scan output
    *, tb, seq_len, panel, mm_dtype,
):
    f32 = jnp.float32
    L = seq_len
    TBL, D = x_ref.shape
    N = nega_ref.shape[0]
    n_panels = D // panel
    n_chunks = L // CHUNK

    def silu(v):
        return v * (1.0 / (1.0 + jnp.exp(-v)))

    # self.proj(x) -- same Linear feeds both branches (big M = TB*L matmul).
    x_in = x_ref[...]
    xp = (jnp.dot(x_in.astype(mm_dtype), wp_ref[...],
                  preferred_element_type=f32) + bp_ref[...])           # (TBL, D)
    x2_s[...] = silu(xp)                      # gate branch, re-read after scan

    # Conv1d(kernel=3, pad=1): channel mixing over L, spatial axis = D (lanes).
    col = lax.broadcasted_iota(jnp.int32, (TBL, D), 1)
    x_m1 = jnp.where(col > 0, pltpu.roll(xp, shift=1, axis=1), 0.0)          # xp[:, d-1]
    x_p1 = jnp.where(col < D - 1, pltpu.roll(xp, shift=D - 1, axis=1), 0.0)  # xp[:, d+1]
    xp_h = xp.astype(mm_dtype)
    x_m1_h = x_m1.astype(mm_dtype)
    x_p1_h = x_p1.astype(mm_dtype)
    w0, w1, w2 = w0_ref[...], w1_ref[...], w2_ref[...]
    bconv = bconv_ref[...]
    for b in range(tb):          # static loop; conv is block-diagonal over batch
        lo = b * L
        conv_b = (jnp.dot(w0, x_m1_h[lo:lo + L, :], preferred_element_type=f32)
                  + jnp.dot(w1, xp_h[lo:lo + L, :], preferred_element_type=f32)
                  + jnp.dot(w2, x_p1_h[lo:lo + L, :], preferred_element_type=f32)
                  + bconv)
        x1_s[pl.ds(lo, L), :] = silu(conv_b)

    # ---- SSM input projections (f32 accumulate) ----
    x1 = x1_s[...]
    x1h = x1.astype(mm_dtype)
    delta_lr = jnp.dot(x1h, wdl_ref[...], preferred_element_type=f32)        # (TBL, R)
    delta_pre = (jnp.dot(delta_lr.astype(mm_dtype), wdt_ref[...],
                         preferred_element_type=f32) + bdt_ref[...])         # (TBL, D)
    # softplus with PyTorch threshold=20 semantics (kept in f32)
    delta = jnp.where(delta_pre > 20.0, delta_pre,
                      jnp.log1p(jnp.exp(jnp.minimum(delta_pre, 20.0))))
    delta_s[...] = delta
    dx_s[...] = delta * x1                    # precompute delta * x1 once
    b_s[...] = jnp.dot(x1h, wb_ref[...], preferred_element_type=f32)         # (TBL, N)
    c_s[...] = jnp.dot(x1h, wc_ref[...], preferred_element_type=f32)         # (TBL, N)

    # ---- selective scan: 8-step chunks over time, static panels over D ----
    @pl.loop(0, tb * n_chunks)
    def _(cidx):
        @pl.when((cidx % n_chunks) == 0)      # new batch element -> reset state
        def _():
            h_s[...] = jnp.zeros_like(h_s)

        t0 = pl.multiple_of(cidx * CHUNK, CHUNK)
        b_c = b_s[pl.ds(t0, CHUNK), :]        # (8, N) shared across panels
        c_c = c_s[pl.ds(t0, CHUNK), :]        # (8, N)

        for p in range(n_panels):             # static lane panels (keep vregs < 64)
            d0 = p * panel
            delta_c = delta_s[pl.ds(t0, CHUNK), pl.ds(d0, panel)]   # (8, P)
            dx_c = dx_s[pl.ds(t0, CHUNK), pl.ds(d0, panel)]         # (8, P)
            negA = nega_ref[:, pl.ds(d0, panel)]                    # (N, P) per-chunk read

            # bulk EUP/VPU work for the whole chunk, off the serial h chain
            dA_all = jnp.exp(delta_c[:, None, :] * negA[None, :, :])   # (8, N, P)
            bx_all = b_c[:, :, None] * dx_c[:, None, :]                # (8, N, P)

            h = h_s[:, pl.ds(d0, panel)]                               # (N, P)
            for j in range(CHUNK):             # unrolled 8-step recurrence
                h = dA_all[j] * h + bx_all[j]
                # y_t = C_t @ h -> one (1,N)@(N,P) dot; full-lane row store
                y_s[pl.ds(t0 + j, 1), pl.ds(d0, panel)] = jnp.dot(
                    c_c[j:j + 1, :], h, preferred_element_type=f32)
            h_s[:, pl.ds(d0, panel)] = h

    # y + D*x skip (inside SSM), gate, residual, final shared projection
    x1 = x1_s[...]
    y = y_s[...] + dpar_ref[...] * x1
    out = y * x2_s[...] + x_ref[...].astype(f32)
    out_ref[...] = (jnp.dot(out.astype(mm_dtype), wp_ref[...],
                            preferred_element_type=f32)
                    + bp_ref[...]).astype(out_ref.dtype)


# ----------------------------------------------------------------------------
# Wrapper
# ----------------------------------------------------------------------------
def cobra_block_forward(x, params):
    Wp, bp, wconv, bconv, Wdl, WB, WC, Wdt, bdt, AlogT, Dp = params
    B, L, D = x.shape
    R = Wdl.shape[1]
    N = WB.shape[1]
    assert L % CHUNK == 0, "seq length (conv channels) must be a multiple of 8"

    # bf16 MXU operands on real TPUs; f32 elsewhere (CPU interpret has no
    # BF16xBF16=F32 dot).  Accumulation is always f32.
    mm_dtype = jnp.bfloat16 if jax.default_backend() == "tpu" else jnp.float32

    # Weight-only prep hoisted out of the kernel.
    negA = -jnp.exp(AlogT)                                  # (N, D) f32
    w0 = wconv[0].astype(mm_dtype)
    w1 = wconv[1].astype(mm_dtype)
    w2 = wconv[2].astype(mm_dtype)
    Wp_h, Wdl_h = Wp.astype(mm_dtype), Wdl.astype(mm_dtype)
    WB_h, WC_h = WB.astype(mm_dtype), WC.astype(mm_dtype)
    Wdt_h = Wdt.astype(mm_dtype)

    # Static D-panel width for the scan (lane-dense, <=512 f32 columns).
    if D % 512 == 0:
        panel = 512
    elif D % 256 == 0:
        panel = 256
    elif D % 128 == 0:
        panel = 128
    else:
        panel = D

    # Batch tiling: TB batch elements per grid step -> matmul rows = TB*L.
    # ~40*D bytes/row of f32 scratch + bf16 I/O + temporaries; keep activations
    # under ~36 MiB so the budget also fits v7x's 64 MiB VMEM.
    row_bytes = 40 * D
    rows_cap = max(CHUNK, (36 * 2 ** 20) // row_bytes)
    target_rows = min(256, rows_cap)
    tb_cap = max(1, target_rows // L)
    if B >= 2:
        tb_cap = min(tb_cap, max(1, B // 2))   # >=2 grid steps -> both v7x cores busy
    TB = 1
    for cand in range(min(B, tb_cap), 0, -1):
        if B % cand == 0:
            TB = cand
            break
    TBL = TB * L
    grid = (B // TB,)

    # bf16 at the HBM boundary (halves in/out DMA bytes).
    x2d = x.reshape(B * L, D).astype(jnp.bfloat16)

    zero2 = lambda i: (0, 0)
    in_specs = [
        pl.BlockSpec((TBL, D), lambda i: (i, 0)),    # x rows for this step
        pl.BlockSpec((D, D), zero2),                 # Wp
        pl.BlockSpec((1, D), zero2),                 # bp
        pl.BlockSpec((L, L), zero2),                 # conv tap d-1
        pl.BlockSpec((L, L), zero2),                 # conv tap d
        pl.BlockSpec((L, L), zero2),                 # conv tap d+1
        pl.BlockSpec((L, 1), zero2),                 # conv bias
        pl.BlockSpec((D, R), zero2),                 # Wdl
        pl.BlockSpec((D, N), zero2),                 # WB
        pl.BlockSpec((D, N), zero2),                 # WC
        pl.BlockSpec((R, D), zero2),                 # Wdt
        pl.BlockSpec((1, D), zero2),                 # bdt
        pl.BlockSpec((N, D), zero2),                 # -exp(A_log)^T
        pl.BlockSpec((1, D), zero2),                 # D param
    ]
    out_specs = pl.BlockSpec((TBL, D), lambda i: (i, 0))

    scratch = [
        pltpu.VMEM((TBL, D), jnp.float32),  # x_two
        pltpu.VMEM((TBL, D), jnp.float32),  # x1
        pltpu.VMEM((TBL, D), jnp.float32),  # delta
        pltpu.VMEM((TBL, D), jnp.float32),  # dx = delta * x1
        pltpu.VMEM((TBL, N), jnp.float32),  # B
        pltpu.VMEM((TBL, N), jnp.float32),  # C
        pltpu.VMEM((N, D), jnp.float32),    # h state
        pltpu.VMEM((TBL, D), jnp.float32),  # y
    ]

    # VMEM budget: scratch + double-buffered I/O blocks & weights + the large
    # live f32 temporaries (xp, x_two, x1, conv, chunk dA/bx slabs), capped at
    # 48 MiB so it also fits v7x's 64 MiB physical VMEM.
    mmb = jnp.dtype(mm_dtype).itemsize
    est = 4 * (5 * TBL * D + 2 * TBL * N + N * D)                  # scratch
    est += 2 * 2 * (2 * TBL * D)                                   # bf16 in/out, dbl-buffered
    est += 2 * mmb * (D * D + 3 * L * L + D * R + 2 * D * N + R * D)
    est += 2 * 4 * (3 * D + L + N * D)                             # f32 biases / negA
    est += 4 * (6 * TBL * D + 2 * CHUNK * N * panel + 2 * N * panel)
    vmem_limit = int(min(max(16 * 2 ** 20, 2 * est), 48 * 2 ** 20))

    kernel = functools.partial(cobra_block_kernel, tb=TB, seq_len=L,
                               panel=panel, mm_dtype=mm_dtype)
    out2d = pl.pallas_call(
        kernel,
        out_shape=jax.ShapeDtypeStruct((B * L, D), jnp.bfloat16),
        grid_spec=pltpu.PrefetchScalarGridSpec(
            num_scalar_prefetch=0,
            grid=grid,
            in_specs=in_specs,
            out_specs=out_specs,
            scratch_shapes=scratch,
        ),
        compiler_params=pltpu.CompilerParams(
            dimension_semantics=("parallel",),       # batch steps are independent
            vmem_limit_bytes=vmem_limit,
        ),
    )(x2d, Wp_h, bp, w0, w1, w2, bconv, Wdl_h, WB_h, WC_h, Wdt_h, bdt, negA, Dp)
    return out2d.reshape(B, L, D)


# ----------------------------------------------------------------------------
# Pure-JAX f32 reference (mirrors the PyTorch CobraBlock forward exactly)
# ----------------------------------------------------------------------------
def cobra_block_reference(x, params):
    Wp, bp, wconv, bconv, Wdl, WB, WC, Wdt, bdt, AlogT, Dp = params
    Bb, L, D = x.shape
    silu = lambda v: v * jax.nn.sigmoid(v)

    xp = x @ Wp + bp
    x_two = silu(xp)

    xpad = jnp.pad(xp, ((0, 0), (0, 0), (1, 1)))
    conv = (
        jnp.einsum("oi,bid->bod", wconv[0], xpad[:, :, 0:D])
        + jnp.einsum("oi,bid->bod", wconv[1], xpad[:, :, 1:D + 1])
        + jnp.einsum("oi,bid->bod", wconv[2], xpad[:, :, 2:D + 2])
        + bconv.reshape(1, L, 1)
    )
    x1 = silu(conv)

    delta = jax.nn.softplus((x1 @ Wdl) @ Wdt + bdt)
    Bm = x1 @ WB
    Cm = x1 @ WC
    A = -jnp.exp(AlogT.T)                               # (D, N)

    dA = jnp.exp(delta[..., None] * A)                  # (B, L, D, N)
    BX = (delta * x1)[..., None] * Bm[:, :, None, :]    # (B, L, D, N)

    h = jnp.zeros((Bb, D, Bm.shape[-1]), jnp.float32)
    ys = []
    for t in range(L):
        h = dA[:, t] * h + BX[:, t]
        ys.append(jnp.einsum("ben,bn->be", h, Cm[:, t]))
    y = jnp.stack(ys, axis=1) + Dp * x1

    out = y * x_two + x
    return out @ Wp + bp


# ----------------------------------------------------------------------------
def make_params(key, dim, seq, dt_rank, d_state):
    ks = jax.random.split(key, 9)
    s = 0.1
    # round matmul weights through bf16 so kernel (bf16 on TPU) & reference
    # (f32) see identical weight values; remaining error is activation casts.
    rnd = lambda a: a.astype(jnp.bfloat16).astype(jnp.float32)
    Wp = rnd(s * jax.random.normal(ks[0], (dim, dim), jnp.float32))
    bp = 0.02 * jax.random.normal(ks[1], (1, dim), jnp.float32)
    wconv = rnd(s * jax.random.normal(ks[2], (3, seq, seq), jnp.float32))
    bconv = 0.02 * jax.random.normal(ks[3], (seq, 1), jnp.float32)
    Wdl = rnd(s * jax.random.normal(ks[4], (dim, dt_rank), jnp.float32))
    WB = rnd(0.5 * jax.random.normal(ks[5], (dim, d_state), jnp.float32))
    WC = rnd(0.5 * jax.random.normal(ks[6], (dim, d_state), jnp.float32))
    Wdt = rnd(s * jax.random.normal(ks[7], (dt_rank, dim), jnp.float32))
    bdt = 0.02 * jax.random.normal(ks[8], (1, dim), jnp.float32)
    # A_log[e, n] = log(n + 1); stored transposed (N, D) for the kernel
    AlogT = jnp.broadcast_to(
        jnp.log(jnp.arange(1, d_state + 1, dtype=jnp.float32))[:, None],
        (d_state, dim))
    Dp = jnp.ones((1, dim), jnp.float32)
    return (Wp, bp, wconv, bconv, Wdl, WB, WC, Wdt, bdt, AlogT, Dp)


if __name__ == "__main__":
    # Small shapes consistent with CobraBlock: seq length == `channels` because
    # Conv1d(in_channels=channels) is applied to the (B, L, dim) tensor, and the
    # shared proj means dim_inner == dim.
    BATCH, SEQ, DIM, DT_RANK, D_STATE = 2, 8, 32, 4, 16

    key = jax.random.PRNGKey(0)
    kx, kp = jax.random.split(key)
    x = jax.random.normal(kx, (BATCH, SEQ, DIM), jnp.float32)
    params = make_params(kp, DIM, SEQ, DT_RANK, D_STATE)

    out = jax.block_until_ready(cobra_block_forward(x, params))
    ref = cobra_block_reference(x, params)

    assert out.shape == ref.shape == (BATCH, SEQ, DIM)
    out_f32 = out.astype(jnp.float32)
    assert bool(jnp.all(jnp.isfinite(out_f32)))
    max_err = float(jnp.max(jnp.abs(out_f32 - ref)))
    # tolerance accounts for bf16 MXU operands and bf16 HBM I/O
    assert max_err < 4e-2, f"mismatch vs reference: max abs err = {max_err}"

    # TODO(synk): the PyTorch forward's print() shape-debug calls have no
    # compute semantics and are intentionally omitted.
    print("KERNEL_OK")
</pallas_src>

<mosaic_0001>
module attributes {stable_mosaic.version = 11 : i64} {
  func.func @cobra_block_kernel(%arg0: i32, %arg1: memref<8x32xbf16, #tpu.memory_space<vmem>>, %arg2: memref<32x32xf32, #tpu.memory_space<vmem>>, %arg3: memref<1x32xf32, #tpu.memory_space<vmem>>, %arg4: memref<8x8xf32, #tpu.memory_space<vmem>>, %arg5: memref<8x8xf32, #tpu.memory_space<vmem>>, %arg6: memref<8x8xf32, #tpu.memory_space<vmem>>, %arg7: memref<8x1xf32, #tpu.memory_space<vmem>>, %arg8: memref<32x4xf32, #tpu.memory_space<vmem>>, %arg9: memref<32x16xf32, #tpu.memory_space<vmem>>, %arg10: memref<32x16xf32, #tpu.memory_space<vmem>>, %arg11: memref<4x32xf32, #tpu.memory_space<vmem>>, %arg12: memref<1x32xf32, #tpu.memory_space<vmem>>, %arg13: memref<16x32xf32, #tpu.memory_space<vmem>>, %arg14: memref<1x32xf32, #tpu.memory_space<vmem>>, %arg15: memref<8x32xbf16, #tpu.memory_space<vmem>>, %arg16: memref<8x32xf32, #tpu.memory_space<vmem>>, %arg17: memref<8x32xf32, #tpu.memory_space<vmem>>, %arg18: memref<8x32xf32, #tpu.memory_space<vmem>>, %arg19: memref<8x32xf32, #tpu.memory_space<vmem>>, %arg20: memref<8x16xf32, #tpu.memory_space<vmem>>, %arg21: memref<8x16xf32, #tpu.memory_space<vmem>>, %arg22: memref<16x32xf32, #tpu.memory_space<vmem>>, %arg23: memref<8x32xf32, #tpu.memory_space<vmem>>) attributes {dimension_semantics = [#tpu.dimension_semantics<parallel>], iteration_bounds = array<i64: 2>, scalar_prefetch = 0 : i64, scratch_operands = 8 : i64, tpu.core_type = #tpu.core_type<tc>, window_params = [{transform_indices = @transform_0, window_bounds = array<i64: 8, 32>}, {pipeline_mode = #tpu.pipeline_mode<synchronous>, transform_indices = @transform_1, window_bounds = array<i64: 32, 32>}, {pipeline_mode = #tpu.pipeline_mode<synchronous>, transform_indices = @transform_2, window_bounds = array<i64: 1, 32>}, {pipeline_mode = #tpu.pipeline_mode<synchronous>, transform_indices = @transform_3, window_bounds = array<i64: 8, 8>}, {pipeline_mode = #tpu.pipeline_mode<synchronous>, transform_indices = @transform_4, window_bounds = array<i64: 8, 8>}, {pipeline_mode = #tpu.pipeline_mode<synchronous>, transform_indices = @transform_5, window_bounds = array<i64: 8, 8>}, {pipeline_mode = #tpu.pipeline_mode<synchronous>, transform_indices = @transform_6, window_bounds = array<i64: 8, 1>}, {pipeline_mode = #tpu.pipeline_mode<synchronous>, transform_indices = @transform_7, window_bounds = array<i64: 32, 4>}, {pipeline_mode = #tpu.pipeline_mode<synchronous>, transform_indices = @transform_8, window_bounds = array<i64: 32, 16>}, {pipeline_mode = #tpu.pipeline_mode<synchronous>, transform_indices = @transform_9, window_bounds = array<i64: 32, 16>}, {pipeline_mode = #tpu.pipeline_mode<synchronous>, transform_indices = @transform_10, window_bounds = array<i64: 4, 32>}, {pipeline_mode = #tpu.pipeline_mode<synchronous>, transform_indices = @transform_11, window_bounds = array<i64: 1, 32>}, {pipeline_mode = #tpu.pipeline_mode<synchronous>, transform_indices = @transform_12, window_bounds = array<i64: 16, 32>}, {pipeline_mode = #tpu.pipeline_mode<synchronous>, transform_indices = @transform_13, window_bounds = array<i64: 1, 32>}, {transform_indices = @transform_14, window_bounds = array<i64: 8, 32>}]} {
    %c0 = arith.constant 0 : index
    %c0_0 = arith.constant 0 : index
    %0 = vector.load %arg1[%c0, %c0_0] : memref<8x32xbf16, #tpu.memory_space<vmem>>, vector<8x32xbf16>
    %1 = arith.extf %0 : vector<8x32xbf16> to vector<8x32xf32>
    %c0_1 = arith.constant 0 : index
    %c0_2 = arith.constant 0 : index
    %2 = vector.load %arg2[%c0_1, %c0_2] : memref<32x32xf32, #tpu.memory_space<vmem>>, vector<32x32xf32>
    %cst = arith.constant dense<0.000000e+00> : vector<8x32xf32>
    %3 = tpu.matmul %1, %2, %cst {dimension_numbers = #tpu.dot_dimension_numbers<[1], [0], [0], [1], [0, 0, 1, 1], [], []>} : vector<8x32xf32>, vector<32x32xf32>, vector<8x32xf32> -> vector<8x32xf32>
    %c0_3 = arith.constant 0 : index
    %c0_4 = arith.constant 0 : index
    %4 = vector.load %arg3[%c0_3, %c0_4] : memref<1x32xf32, #tpu.memory_space<vmem>>, vector<1x32xf32>
    %5 = vector.broadcast %4 : vector<1x32xf32> to vector<8x32xf32>
    %6 = arith.addf %3, %5 : vector<8x32xf32>
    %cst_5 = arith.constant 0.000000e+00 : f32
    %7 = vector.broadcast %cst_5 : f32 to vector<8x32xf32>
    %8 = arith.subf %7, %6 : vector<8x32xf32>
    %9 = math.exp %8 : vector<8x32xf32>
    %cst_6 = arith.constant 1.000000e+00 : f32
    %10 = vector.broadcast %cst_6 : f32 to vector<8x32xf32>
    %11 = arith.addf %10, %9 : vector<8x32xf32>
    %cst_7 = arith.constant 1.000000e+00 : f32
    %12 = vector.broadcast %cst_7 : f32 to vector<8x32xf32>
    %13 = arith.divf %12, %11 : vector<8x32xf32>
    %14 = arith.mulf %6, %13 : vector<8x32xf32>
    %c0_8 = arith.constant 0 : index
    %c0_9 = arith.constant 0 : index
    %15 = vector.load %arg16[%c0_8, %c0_9] : memref<8x32xf32, #tpu.memory_space<vmem>>, vector<8x32xf32>
    tpu.vector_store %arg16[%c0_8, %c0_9], %14 {strides = array<i32>} : memref<8x32xf32, #tpu.memory_space<vmem>>, vector<8x32xf32>,
    %16 = tpu.iota {dimensions = array<i32: 1>} : vector<8x32xi32>
    %c0_i32 = arith.constant 0 : i32
    %17 = vector.broadcast %c0_i32 : i32 to vector<8x32xi32>
    %18 = arith.cmpi sgt, %16, %17 : vector<8x32xi32>
    %c1_i32 = arith.constant 1 : i32
    %19 = tpu.dynamic_rotate %6 by %c1_i32 dim 1 : vector<8x32xf32>, i32 -> vector<8x32xf32>
    %cst_10 = arith.constant 0.000000e+00 : f32
    %20 = vector.broadcast %cst_10 : f32 to vector<8x32xf32>
    %21 = arith.select %18, %19, %20 : vector<8x32xi1>, vector<8x32xf32>
    %c31_i32 = arith.constant 31 : i32
    %22 = vector.broadcast %c31_i32 : i32 to vector<8x32xi32>
    %23 = arith.cmpi slt, %16, %22 : vector<8x32xi32>
    %c31_i32_11 = arith.constant 31 : i32
    %24 = tpu.dynamic_rotate %6 by %c31_i32_11 dim 1 : vector<8x32xf32>, i32 -> vector<8x32xf32>
    %cst_12 = arith.constant 0.000000e+00 : f32
    %25 = vector.broadcast %cst_12 : f32 to vector<8x32xf32>
    %26 = arith.select %23, %24, %25 : vector<8x32xi1>, vector<8x32xf32>
    %c0_13 = arith.constant 0 : index
    %c0_14 = arith.constant 0 : index
    %27 = vector.load %arg4[%c0_13, %c0_14] : memref<8x8xf32, #tpu.memory_space<vmem>>, vector<8x8xf32>
    %c0_15 = arith.constant 0 : index
    %c0_16 = arith.constant 0 : index
    %28 = vector.load %arg5[%c0_15, %c0_16] : memref<8x8xf32, #tpu.memory_space<vmem>>, vector<8x8xf32>
    %c0_17 = arith.constant 0 : index
    %c0_18 = arith.constant 0 : index
    %29 = vector.load %arg6[%c0_17, %c0_18] : memref<8x8xf32, #tpu.memory_space<vmem>>, vector<8x8xf32>
    %c0_19 = arith.constant 0 : index
    %c0_20 = arith.constant 0 : index
    %30 = vector.load %arg7[%c0_19, %c0_20] : memref<8x1xf32, #tpu.memory_space<vmem>>, vector<8x1xf32>
    %cst_21 = arith.constant dense<0.000000e+00> : vector<8x32xf32>
    %31 = tpu.matmul %27, %21, %cst_21 {dimension_numbers = #tpu.dot_dimension_numbers<[1], [0], [0], [1], [0, 0, 1, 1], [], []>} : vector<8x8xf32>, vector<8x32xf32>, vector<8x32xf32> -> vector<8x32xf32>
    %cst_22 = arith.constant dense<0.000000e+00> : vector<8x32xf32>
    %32 = tpu.matmul %28, %6, %cst_22 {dimension_numbers = #tpu.dot_dimension_numbers<[1], [0], [0], [1], [0, 0, 1, 1], [], []>} : vector<8x8xf32>, vector<8x32xf32>, vector<8x32xf32> -> vector<8x32xf32>
    %33 = arith.addf %31, %32 : vector<8x32xf32>
    %cst_23 = arith.constant dense<0.000000e+00> : vector<8x32xf32>
    %34 = tpu.matmul %29, %26, %cst_23 {dimension_numbers = #tpu.dot_dimension_numbers<[1], [0], [0], [1], [0, 0, 1, 1], [], []>} : vector<8x8xf32>, vector<8x32xf32>, vector<8x32xf32> -> vector<8x32xf32>
    %35 = arith.addf %33, %34 : vector<8x32xf32>
    %36 = vector.broadcast %30 : vector<8x1xf32> to vector<8x32xf32>
    %37 = arith.addf %35, %36 : vector<8x32xf32>
    %cst_24 = arith.constant 0.000000e+00 : f32
    %38 = vector.broadcast %cst_24 : f32 to vector<8x32xf32>
    %39 = arith.subf %38, %37 : vector<8x32xf32>
    %40 = math.exp %39 : vector<8x32xf32>
    %cst_25 = arith.constant 1.000000e+00 : f32
    %41 = vector.broadcast %cst_25 : f32 to vector<8x32xf32>
    %42 = arith.addf %41, %40 : vector<8x32xf32>
    %cst_26 = arith.constant 1.000000e+00 : f32
    %43 = vector.broadcast %cst_26 : f32 to vector<8x32xf32>
    %44 = arith.divf %43, %42 : vector<8x32xf32>
    %45 = arith.mulf %37, %44 : vector<8x32xf32>
    %c0_27 = arith.constant 0 : index
    %c0_28 = arith.constant 0 : index
    %46 = vector.load %arg17[%c0_27, %c0_28] : memref<8x32xf32, #tpu.memory_space<vmem>>, vector<8x32xf32>
    tpu.vector_store %arg17[%c0_27, %c0_28], %45 {strides = array<i32>} : memref<8x32xf32, #tpu.memory_space<vmem>>, vector<8x32xf32>,
    %c0_29 = arith.constant 0 : index
    %c0_30 = arith.constant 0 : index
    %47 = vector.load %arg17[%c0_29, %c0_30] : memref<8x32xf32, #tpu.memory_space<vmem>>, vector<8x32xf32>
    %c0_31 = arith.constant 0 : index
    %c0_32 = arith.constant 0 : index
    %48 = vector.load %arg8[%c0_31, %c0_32] : memref<32x4xf32, #tpu.memory_space<vmem>>, vector<32x4xf32>
    %cst_33 = arith.constant dense<0.000000e+00> : vector<8x4xf32>
    %49 = tpu.matmul %47, %48, %cst_33 {dimension_numbers = #tpu.dot_dimension_numbers<[1], [0], [0], [1], [0, 0, 1, 1], [], []>} : vector<8x32xf32>, vector<32x4xf32>, vector<8x4xf32> -> vector<8x4xf32>
    %c0_34 = arith.constant 0 : index
    %c0_35 = arith.constant 0 : index
    %50 = vector.load %arg11[%c0_34, %c0_35] : memref<4x32xf32, #tpu.memory_space<vmem>>, vector<4x32xf32>
    %cst_36 = arith.constant dense<0.000000e+00> : vector<8x32xf32>
    %51 = tpu.matmul %49, %50, %cst_36 {dimension_numbers = #tpu.dot_dimension_numbers<[1], [0], [0], [1], [0, 0, 1, 1], [], []>} : vector<8x4xf32>, vector<4x32xf32>, vector<8x32xf32> -> vector<8x32xf32>
    %c0_37 = arith.constant 0 : index
    %c0_38 = arith.constant 0 : index
    %52 = vector.load %arg12[%c0_37, %c0_38] : memref<1x32xf32, #tpu.memory_space<vmem>>, vector<1x32xf32>
    %53 = vector.broadcast %52 : vector<1x32xf32> to vector<8x32xf32>
    %54 = arith.addf %51, %53 : vector<8x32xf32>
    %cst_39 = arith.constant 2.000000e+01 : f32
    %55 = vector.broadcast %cst_39 : f32 to vector<8x32xf32>
    %56 = arith.cmpf ogt, %54, %55 : vector<8x32xf32>
    %cst_40 = arith.constant 2.000000e+01 : f32
    %57 = vector.broadcast %cst_40 : f32 to vector<8x32xf32>
    %58 = arith.minimumf %54, %57 : vector<8x32xf32>
    %59 = math.exp %58 : vector<8x32xf32>
    %60 = math.log1p %59 : vector<8x32xf32>
    %61 = arith.select %56, %54, %60 : vector<8x32xi1>, vector<8x32xf32>
    %c0_41 = arith.constant 0 : index
    %c0_42 = arith.constant 0 : index
    %62 = vector.load %arg18[%c0_41, %c0_42] : memref<8x32xf32, #tpu.memory_space<vmem>>, vector<8x32xf32>
    tpu.vector_store %arg18[%c0_41, %c0_42], %61 {strides = array<i32>} : memref<8x32xf32, #tpu.memory_space<vmem>>, vector<8x32xf32>,
    %63 = arith.mulf %61, %47 : vector<8x32xf32>
    %c0_43 = arith.constant 0 : index
    %c0_44 = arith.constant 0 : index
    %64 = vector.load %arg19[%c0_43, %c0_44] : memref<8x32xf32, #tpu.memory_space<vmem>>, vector<8x32xf32>
    tpu.vector_store %arg19[%c0_43, %c0_44], %63 {strides = array<i32>} : memref<8x32xf32, #tpu.memory_space<vmem>>, vector<8x32xf32>,
    %c0_45 = arith.constant 0 : index
    %c0_46 = arith.constant 0 : index
    %65 = vector.load %arg9[%c0_45, %c0_46] : memref<32x16xf32, #tpu.memory_space<vmem>>, vector<32x16xf32>
    %cst_47 = arith.constant dense<0.000000e+00> : vector<8x16xf32>
    %66 = tpu.matmul %47, %65, %cst_47 {dimension_numbers = #tpu.dot_dimension_numbers<[1], [0], [0], [1], [0, 0, 1, 1], [], []>} : vector<8x32xf32>, vector<32x16xf32>, vector<8x16xf32> -> vector<8x16xf32>
    %c0_48 = arith.constant 0 : index
    %c0_49 = arith.constant 0 : index
    %67 = vector.load %arg20[%c0_48, %c0_49] : memref<8x16xf32, #tpu.memory_space<vmem>>, vector<8x16xf32>
    tpu.vector_store %arg20[%c0_48, %c0_49], %66 {strides = array<i32>} : memref<8x16xf32, #tpu.memory_space<vmem>>, vector<8x16xf32>,
    %c0_50 = arith.constant 0 : index
    %c0_51 = arith.constant 0 : index
    %68 = vector.load %arg10[%c0_50, %c0_51] : memref<32x16xf32, #tpu.memory_space<vmem>>, vector<32x16xf32>
    %cst_52 = arith.constant dense<0.000000e+00> : vector<8x16xf32>
    %69 = tpu.matmul %47, %68, %cst_52 {dimension_numbers = #tpu.dot_dimension_numbers<[1], [0], [0], [1], [0, 0, 1, 1], [], []>} : vector<8x32xf32>, vector<32x16xf32>, vector<8x16xf32> -> vector<8x16xf32>
    %c0_53 = arith.constant 0 : index
    %c0_54 = arith.constant 0 : index
    %70 = vector.load %arg21[%c0_53, %c0_54] : memref<8x16xf32, #tpu.memory_space<vmem>>, vector<8x16xf32>
    tpu.vector_store %arg21[%c0_53, %c0_54], %69 {strides = array<i32>} : memref<8x16xf32, #tpu.memory_space<vmem>>, vector<8x16xf32>,
    %c0_i32_55 = arith.constant 0 : i32
    %c1_i32_56 = arith.constant 1 : i32
    %71 = arith.muli %c0_i32_55, %c1_i32_56 : i32
    %c0_i32_57 = arith.constant 0 : i32
    %72 = arith.addi %c0_i32_57, %71 : i32
    %c1_i32_58 = arith.constant 1 : i32
    %c0_i32_59 = arith.constant 0 : i32
    %73 = arith.cmpi eq, %c1_i32_58, %c0_i32_59 : i32
    %c1_i32_60 = arith.constant 1 : i32
    %74 = arith.select %73, %c1_i32_60, %c1_i32_58 : i32
    %75 = arith.remsi %72, %74 : i32
    %c0_i32_61 = arith.constant 0 : i32
    %76 = arith.cmpi ne, %75, %c0_i32_61 : i32
    %c0_i32_62 = arith.constant 0 : i32
    %77 = arith.cmpi slt, %75, %c0_i32_62 : i32
    %c0_i32_63 = arith.constant 0 : i32
    %78 = arith.cmpi slt, %74, %c0_i32_63 : i32
    %79 = arith.xori %77, %78 : i1
    %80 = arith.andi %79, %76 : i1
    %81 = arith.addi %75, %74 : i32
    %82 = arith.select %80, %81, %75 : i32
    %c0_i32_64 = arith.constant 0 : i32
    %83 = arith.cmpi eq, %82, %c0_i32_64 : i32
    %84 = arith.extui %83 : i1 to i32
    %c0_i32_65 = arith.constant 0 : i32
    %85 = arith.cmpi ne, %84, %c0_i32_65 : i32
    scf.if %85 {
      %cst_112 = arith.constant 0.000000e+00 : f32
      %216 = vector.broadcast %cst_112 : f32 to vector<16x32xf32>
      %c0_113 = arith.constant 0 : index
      %c0_114 = arith.constant 0 : index
      %217 = vector.load %arg22[%c0_113, %c0_114] : memref<16x32xf32, #tpu.memory_space<vmem>>, vector<16x32xf32>
      tpu.vector_store %arg22[%c0_113, %c0_114], %216 {strides = array<i32>} : memref<16x32xf32, #tpu.memory_space<vmem>>, vector<16x32xf32>,
    } else {
    }
    %c8_i32 = arith.constant 8 : i32
    %86 = arith.muli %72, %c8_i32 : i32
    %87 = tpu.assume_multiple %86, 8 : i32
    %88 = arith.index_cast %87 : i32 to index
    %c0_66 = arith.constant 0 : index
    %89 = vector.load %arg20[%88, %c0_66] : memref<8x16xf32, #tpu.memory_space<vmem>>, vector<8x16xf32>
    %90 = arith.index_cast %87 : i32 to index
    %c0_67 = arith.constant 0 : index
    %91 = vector.load %arg21[%90, %c0_67] : memref<8x16xf32, #tpu.memory_space<vmem>>, vector<8x16xf32>
    %92 = arith.index_cast %87 : i32 to index
    %c0_68 = arith.constant 0 : index
    %93 = vector.load %arg18[%92, %c0_68] : memref<8x32xf32, #tpu.memory_space<vmem>>, vector<8x32xf32>
    %94 = arith.index_cast %87 : i32 to index
    %c0_69 = arith.constant 0 : index
    %95 = vector.load %arg19[%94, %c0_69] : memref<8x32xf32, #tpu.memory_space<vmem>>, vector<8x32xf32>
    %c0_70 = arith.constant 0 : index
    %c0_71 = arith.constant 0 : index
    %96 = vector.load %arg13[%c0_70, %c0_71] : memref<16x32xf32, #tpu.memory_space<vmem>>, vector<16x32xf32>
    %97 = vector.shape_cast %93 : vector<8x32xf32> to vector<8x1x32xf32>
    %98 = vector.shape_cast %96 : vector<16x32xf32> to vector<1x16x32xf32>
    %99 = vector.broadcast %97 : vector<8x1x32xf32> to vector<8x16x32xf32>
    %100 = vector.broadcast %98 : vector<1x16x32xf32> to vector<8x16x32xf32>
    %101 = arith.mulf %99, %100 : vector<8x16x32xf32>
    %102 = math.exp %101 : vector<8x16x32xf32>
    %103 = vector.shape_cast %89 : vector<8x16xf32> to vector<8x16x1xf32>
    %104 = vector.shape_cast %95 : vector<8x32xf32> to vector<8x1x32xf32>
    %105 = vector.broadcast %103 : vector<8x16x1xf32> to vector<8x16x32xf32>
    %106 = vector.broadcast %104 : vector<8x1x32xf32> to vector<8x16x32xf32>
    %107 = arith.mulf %105, %106 : vector<8x16x32xf32>
    %c0_72 = arith.constant 0 : index
    %c0_73 = arith.constant 0 : index
    %108 = vector.load %arg22[%c0_72, %c0_73] : memref<16x32xf32, #tpu.memory_space<vmem>>, vector<16x32xf32>
    %109 = vector.extract_strided_slice %102 {offsets = [0, 0, 0], sizes = [1, 16, 32], strides = [1, 1, 1]} : vector<8x16x32xf32> to vector<1x16x32xf32>
    %110 = vector.shape_cast %109 : vector<1x16x32xf32> to vector<16x32xf32>
    %111 = arith.mulf %110, %108 : vector<16x32xf32>
    %112 = vector.extract_strided_slice %107 {offsets = [0, 0, 0], sizes = [1, 16, 32], strides = [1, 1, 1]} : vector<8x16x32xf32> to vector<1x16x32xf32>
    %113 = vector.shape_cast %112 : vector<1x16x32xf32> to vector<16x32xf32>
    %114 = arith.addf %111, %113 : vector<16x32xf32>
    %115 = vector.extract_strided_slice %91 {offsets = [0, 0], sizes = [1, 16], strides = [1, 1]} : vector<8x16xf32> to vector<1x16xf32>
    %cst_74 = arith.constant dense<0.000000e+00> : vector<1x32xf32>
    %116 = tpu.matmul %115, %114, %cst_74 {dimension_numbers = #tpu.dot_dimension_numbers<[1], [0], [0], [1], [0, 0, 1, 1], [], []>} : vector<1x16xf32>, vector<16x32xf32>, vector<1x32xf32> -> vector<1x32xf32>
    %c0_i32_75 = arith.constant 0 : i32
    %117 = arith.addi %87, %c0_i32_75 : i32
    %118 = arith.index_cast %117 : i32 to index
    %c0_76 = arith.constant 0 : index
    %119 = vector.load %arg23[%118, %c0_76] : memref<8x32xf32, #tpu.memory_space<vmem>>, vector<1x32xf32>
    tpu.vector_store %arg23[%118, %c0_76], %116 {strides = array<i32>} : memref<8x32xf32, #tpu.memory_space<vmem>>, vector<1x32xf32>,
    %120 = vector.extract_strided_slice %102 {offsets = [1, 0, 0], sizes = [1, 16, 32], strides = [1, 1, 1]} : vector<8x16x32xf32> to vector<1x16x32xf32>
    %121 = vector.shape_cast %120 : vector<1x16x32xf32> to vector<16x32xf32>
    %122 = arith.mulf %121, %114 : vector<16x32xf32>
    %123 = vector.extract_strided_slice %107 {offsets = [1, 0, 0], sizes = [1, 16, 32], strides = [1, 1, 1]} : vector<8x16x32xf32> to vector<1x16x32xf32>
    %124 = vector.shape_cast %123 : vector<1x16x32xf32> to vector<16x32xf32>
    %125 = arith.addf %122, %124 : vector<16x32xf32>
    %126 = vector.extract_strided_slice %91 {offsets = [1, 0], sizes = [1, 16], strides = [1, 1]} : vector<8x16xf32> to vector<1x16xf32>
    %cst_77 = arith.constant dense<0.000000e+00> : vector<1x32xf32>
    %127 = tpu.matmul %126, %125, %cst_77 {dimension_numbers = #tpu.dot_dimension_numbers<[1], [0], [0], [1], [0, 0, 1, 1], [], []>} : vector<1x16xf32>, vector<16x32xf32>, vector<1x32xf32> -> vector<1x32xf32>
    %c1_i32_78 = arith.constant 1 : i32
    %128 = arith.addi %87, %c1_i32_78 : i32
    %129 = arith.index_cast %128 : i32 to index
    %c0_79 = arith.constant 0 : index
    %130 = vector.load %arg23[%129, %c0_79] : memref<8x32xf32, #tpu.memory_space<vmem>>, vector<1x32xf32>
    tpu.vector_store %arg23[%129, %c0_79], %127 {strides = array<i32>} : memref<8x32xf32, #tpu.memory_space<vmem>>, vector<1x32xf32>,
    %131 = vector.extract_strided_slice %102 {offsets = [2, 0, 0], sizes = [1, 16, 32], strides = [1, 1, 1]} : vector<8x16x32xf32> to vector<1x16x32xf32>
    %132 = vector.shape_cast %131 : vector<1x16x32xf32> to vector<16x32xf32>
    %133 = arith.mulf %132, %125 : vector<16x32xf32>
    %134 = vector.extract_strided_slice %107 {offsets = [2, 0, 0], sizes = [1, 16, 32], strides = [1, 1, 1]} : vector<8x16x32xf32> to vector<1x16x32xf32>
    %135 = vector.shape_cast %134 : vector<1x16x32xf32> to vector<16x32xf32>
    %136 = arith.addf %133, %135 : vector<16x32xf32>
    %137 = vector.extract_strided_slice %91 {offsets = [2, 0], sizes = [1, 16], strides = [1, 1]} : vector<8x16xf32> to vector<1x16xf32>
    %cst_80 = arith.constant dense<0.000000e+00> : vector<1x32xf32>
    %138 = tpu.matmul %137, %136, %cst_80 {dimension_numbers = #tpu.dot_dimension_numbers<[1], [0], [0], [1], [0, 0, 1, 1], [], []>} : vector<1x16xf32>, vector<16x32xf32>, vector<1x32xf32> -> vector<1x32xf32>
    %c2_i32 = arith.constant 2 : i32
    %139 = arith.addi %87, %c2_i32 : i32
    %140 = arith.index_cast %139 : i32 to index
    %c0_81 = arith.constant 0 : index
    %141 = vector.load %arg23[%140, %c0_81] : memref<8x32xf32, #tpu.memory_space<vmem>>, vector<1x32xf32>
    tpu.vector_store %arg23[%140, %c0_81], %138 {strides = array<i32>} : memref<8x32xf32, #tpu.memory_space<vmem>>, vector<1x32xf32>,
    %142 = vector.extract_strided_slice %102 {offsets = [3, 0, 0], sizes = [1, 16, 32], strides = [1, 1, 1]} : vector<8x16x32xf32> to vector<1x16x32xf32>
    %143 = vector.shape_cast %142 : vector<1x16x32xf32> to vector<16x32xf32>
    %144 = arith.mulf %143, %136 : vector<16x32xf32>
    %145 = vector.extract_strided_slice %107 {offsets = [3, 0, 0], sizes = [1, 16, 32], strides = [1, 1, 1]} : vector<8x16x32xf32> to vector<1x16x32xf32>
    %146 = vector.shape_cast %145 : vector<1x16x32xf32> to vector<16x32xf32>
    %147 = arith.addf %144, %146 : vector<16x32xf32>
    %148 = vector.extract_strided_slice %91 {offsets = [3, 0], sizes = [1, 16], strides = [1, 1]} : vector<8x16xf32> to vector<1x16xf32>
    %cst_82 = arith.constant dense<0.000000e+00> : vector<1x32xf32>
    %149 = tpu.matmul %148, %147, %cst_82 {dimension_numbers = #tpu.dot_dimension_numbers<[1], [0], [0], [1], [0, 0, 1, 1], [], []>} : vector<1x16xf32>, vector<16x32xf32>, vector<1x32xf32> -> vector<1x32xf32>
    %c3_i32 = arith.constant 3 : i32
    %150 = arith.addi %87, %c3_i32 : i32
    %151 = arith.index_cast %150 : i32 to index
    %c0_83 = arith.constant 0 : index
    %152 = vector.load %arg23[%151, %c0_83] : memref<8x32xf32, #tpu.memory_space<vmem>>, vector<1x32xf32>
    tpu.vector_store %arg23[%151, %c0_83], %149 {strides = array<i32>} : memref<8x32xf32, #tpu.memory_space<vmem>>, vector<1x32xf32>,
    %153 = vector.extract_strided_slice %102 {offsets = [4, 0, 0], sizes = [1, 16, 32], strides = [1, 1, 1]} : vector<8x16x32xf32> to vector<1x16x32xf32>
    %154 = vector.shape_cast %153 : vector<1x16x32xf32> to vector<16x32xf32>
    %155 = arith.mulf %154, %147 : vector<16x32xf32>
    %156 = vector.extract_strided_slice %107 {offsets = [4, 0, 0], sizes = [1, 16, 32], strides = [1, 1, 1]} : vector<8x16x32xf32> to vector<1x16x32xf32>
    %157 = vector.shape_cast %156 : vector<1x16x32xf32> to vector<16x32xf32>
    %158 = arith.addf %155, %157 : vector<16x32xf32>
    %159 = vector.extract_strided_slice %91 {offsets = [4, 0], sizes = [1, 16], strides = [1, 1]} : vector<8x16xf32> to vector<1x16xf32>
    %cst_84 = arith.constant dense<0.000000e+00> : vector<1x32xf32>
    %160 = tpu.matmul %159, %158, %cst_84 {dimension_numbers = #tpu.dot_dimension_numbers<[1], [0], [0], [1], [0, 0, 1, 1], [], []>} : vector<1x16xf32>, vector<16x32xf32>, vector<1x32xf32> -> vector<1x32xf32>
    %c4_i32 = arith.constant 4 : i32
    %161 = arith.addi %87, %c4_i32 : i32
    %162 = arith.index_cast %161 : i32 to index
    %c0_85 = arith.constant 0 : index
    %163 = vector.load %arg23[%162, %c0_85] : memref<8x32xf32, #tpu.memory_space<vmem>>, vector<1x32xf32>
    tpu.vector_store %arg23[%162, %c0_85], %160 {strides = array<i32>} : memref<8x32xf32, #tpu.memory_space<vmem>>, vector<1x32xf32>,
    %164 = vector.extract_strided_slice %102 {offsets = [5, 0, 0], sizes = [1, 16, 32], strides = [1, 1, 1]} : vector<8x16x32xf32> to vector<1x16x32xf32>
    %165 = vector.shape_cast %164 : vector<1x16x32xf32> to vector<16x32xf32>
    %166 = arith.mulf %165, %158 : vector<16x32xf32>
    %167 = vector.extract_strided_slice %107 {offsets = [5, 0, 0], sizes = [1, 16, 32], strides = [1, 1, 1]} : vector<8x16x32xf32> to vector<1x16x32xf32>
    %168 = vector.shape_cast %167 : vector<1x16x32xf32> to vector<16x32xf32>
    %169 = arith.addf %166, %168 : vector<16x32xf32>
    %170 = vector.extract_strided_slice %91 {offsets = [5, 0], sizes = [1, 16], strides = [1, 1]} : vector<8x16xf32> to vector<1x16xf32>
    %cst_86 = arith.constant dense<0.000000e+00> : vector<1x32xf32>
    %171 = tpu.matmul %170, %169, %cst_86 {dimension_numbers = #tpu.dot_dimension_numbers<[1], [0], [0], [1], [0, 0, 1, 1], [], []>} : vector<1x16xf32>, vector<16x32xf32>, vector<1x32xf32> -> vector<1x32xf32>
    %c5_i32 = arith.constant 5 : i32
    %172 = arith.addi %87, %c5_i32 : i32
    %173 = arith.index_cast %172 : i32 to index
    %c0_87 = arith.constant 0 : index
    %174 = vector.load %arg23[%173, %c0_87] : memref<8x32xf32, #tpu.memory_space<vmem>>, vector<1x32xf32>
    tpu.vector_store %arg23[%173, %c0_87], %171 {strides = array<i32>} : memref<8x32xf32, #tpu.memory_space<vmem>>, vector<1x32xf32>,
    %175 = vector.extract_strided_slice %102 {offsets = [6, 0, 0], sizes = [1, 16, 32], strides = [1, 1, 1]} : vector<8x16x32xf32> to vector<1x16x32xf32>
    %176 = vector.shape_cast %175 : vector<1x16x32xf32> to vector<16x32xf32>
    %177 = arith.mulf %176, %169 : vector<16x32xf32>
    %178 = vector.extract_strided_slice %107 {offsets = [6, 0, 0], sizes = [1, 16, 32], strides = [1, 1, 1]} : vector<8x16x32xf32> to vector<1x16x32xf32>
    %179 = vector.shape_cast %178 : vector<1x16x32xf32> to vector<16x32xf32>
    %180 = arith.addf %177, %179 : vector<16x32xf32>
    %181 = vector.extract_strided_slice %91 {offsets = [6, 0], sizes = [1, 16], strides = [1, 1]} : vector<8x16xf32> to vector<1x16xf32>
    %cst_88 = arith.constant dense<0.000000e+00> : vector<1x32xf32>
    %182 = tpu.matmul %181, %180, %cst_88 {dimension_numbers = #tpu.dot_dimension_numbers<[1], [0], [0], [1], [0, 0, 1, 1], [], []>} : vector<1x16xf32>, vector<16x32xf32>, vector<1x32xf32> -> vector<1x32xf32>
    %c6_i32 = arith.constant 6 : i32
    %183 = arith.addi %87, %c6_i32 : i32
    %184 = arith.index_cast %183 : i32 to index
    %c0_89 = arith.constant 0 : index
    %185 = vector.load %arg23[%184, %c0_89] : memref<8x32xf32, #tpu.memory_space<vmem>>, vector<1x32xf32>
    tpu.vector_store %arg23[%184, %c0_89], %182 {strides = array<i32>} : memref<8x32xf32, #tpu.memory_space<vmem>>, vector<1x32xf32>,
    %186 = vector.extract_strided_slice %102 {offsets = [7, 0, 0], sizes = [1, 16, 32], strides = [1, 1, 1]} : vector<8x16x32xf32> to vector<1x16x32xf32>
    %187 = vector.shape_cast %186 : vector<1x16x32xf32> to vector<16x32xf32>
    %188 = arith.mulf %187, %180 : vector<16x32xf32>
    %189 = vector.extract_strided_slice %107 {offsets = [7, 0, 0], sizes = [1, 16, 32], strides = [1, 1, 1]} : vector<8x16x32xf32> to vector<1x16x32xf32>
    %190 = vector.shape_cast %189 : vector<1x16x32xf32> to vector<16x32xf32>
    %191 = arith.addf %188, %190 : vector<16x32xf32>
    %192 = vector.extract_strided_slice %91 {offsets = [7, 0], sizes = [1, 16], strides = [1, 1]} : vector<8x16xf32> to vector<1x16xf32>
    %cst_90 = arith.constant dense<0.000000e+00> : vector<1x32xf32>
    %193 = tpu.matmul %192, %191, %cst_90 {dimension_numbers = #tpu.dot_dimension_numbers<[1], [0], [0], [1], [0, 0, 1, 1], [], []>} : vector<1x16xf32>, vector<16x32xf32>, vector<1x32xf32> -> vector<1x32xf32>
    %c7_i32 = arith.constant 7 : i32
    %194 = arith.addi %87, %c7_i32 : i32
    %195 = arith.index_cast %194 : i32 to index
    %c0_91 = arith.constant 0 : index
    %196 = vector.load %arg23[%195, %c0_91] : memref<8x32xf32, #tpu.memory_space<vmem>>, vector<1x32xf32>
    tpu.vector_store %arg23[%195, %c0_91], %193 {strides = array<i32>} : memref<8x32xf32, #tpu.memory_space<vmem>>, vector<1x32xf32>,
    %c0_92 = arith.constant 0 : index
    %c0_93 = arith.constant 0 : index
    %197 = vector.load %arg22[%c0_92, %c0_93] : memref<16x32xf32, #tpu.memory_space<vmem>>, vector<16x32xf32>
    tpu.vector_store %arg22[%c0_92, %c0_93], %191 {strides = array<i32>} : memref<16x32xf32, #tpu.memory_space<vmem>>, vector<16x32xf32>,
    %c1_i32_94 = arith.constant 1 : i32
    %c0_95 = arith.constant 0 : index
    %c0_96 = arith.constant 0 : index
    %198 = vector.load %arg17[%c0_95, %c0_96] : memref<8x32xf32, #tpu.memory_space<vmem>>, vector<8x32xf32>
    %c0_97 = arith.constant 0 : index
    %c0_98 = arith.constant 0 : index
    %199 = vector.load %arg23[%c0_97, %c0_98] : memref<8x32xf32, #tpu.memory_space<vmem>>, vector<8x32xf32>
    %c0_99 = arith.constant 0 : index
    %c0_100 = arith.constant 0 : index
    %200 = vector.load %arg14[%c0_99, %c0_100] : memref<1x32xf32, #tpu.memory_space<vmem>>, vector<1x32xf32>
    %201 = vector.broadcast %200 : vector<1x32xf32> to vector<8x32xf32>
    %202 = arith.mulf %201, %198 : vector<8x32xf32>
    %203 = arith.addf %199, %202 : vector<8x32xf32>
    %c0_101 = arith.constant 0 : index
    %c0_102 = arith.constant 0 : index
    %204 = vector.load %arg16[%c0_101, %c0_102] : memref<8x32xf32, #tpu.memory_space<vmem>>, vector<8x32xf32>
    %205 = arith.mulf %203, %204 : vector<8x32xf32>
    %c0_103 = arith.constant 0 : index
    %c0_104 = arith.constant 0 : index
    %206 = vector.load %arg1[%c0_103, %c0_104] : memref<8x32xbf16, #tpu.memory_space<vmem>>, vector<8x32xbf16>
    %207 = arith.extf %206 : vector<8x32xbf16> to vector<8x32xf32>
    %208 = arith.addf %205, %207 : vector<8x32xf32>
    %c0_105 = arith.constant 0 : index
    %c0_106 = arith.constant 0 : index
    %209 = vector.load %arg2[%c0_105, %c0_106] : memref<32x32xf32, #tpu.memory_space<vmem>>, vector<32x32xf32>
    %cst_107 = arith.constant dense<0.000000e+00> : vector<8x32xf32>
    %210 = tpu.matmul %208, %209, %cst_107 {dimension_numbers = #tpu.dot_dimension_numbers<[1], [0], [0], [1], [0, 0, 1, 1], [], []>} : vector<8x32xf32>, vector<32x32xf32>, vector<8x32xf32> -> vector<8x32xf32>
    %c0_108 = arith.constant 0 : index
    %c0_109 = arith.constant 0 : index
    %211 = vector.load %arg3[%c0_108, %c0_109] : memref<1x32xf32, #tpu.memory_space<vmem>>, vector<1x32xf32>
    %212 = vector.broadcast %211 : vector<1x32xf32> to vector<8x32xf32>
    %213 = arith.addf %210, %212 : vector<8x32xf32>
    %214 = arith.truncf %213 : vector<8x32xf32> to vector<8x32xbf16>
    %c0_110 = arith.constant 0 : index
    %c0_111 = arith.constant 0 : index
    %215 = vector.load %arg15[%c0_110, %c0_111] : memref<8x32xbf16, #tpu.memory_space<vmem>>, vector<8x32xbf16>
    tpu.vector_store %arg15[%c0_110, %c0_111], %214 {strides = array<i32>} : memref<8x32xbf16, #tpu.memory_space<vmem>>, vector<8x32xbf16>,
    return
  }
  func.func @transform_0(%arg0: i32) -> (i32, i32) {
    %c0_i32 = arith.constant 0 : i32
    %c0_i32_0 = arith.constant 0 : i32
    return %arg0, %c0_i32 : i32, i32
  }
  func.func @transform_1(%arg0: i32) -> (i32, i32) {
    %c0_i32 = arith.constant 0 : i32
    %c0_i32_0 = arith.constant 0 : i32
    %c0_i32_1 = arith.constant 0 : i32
    return %c0_i32, %c0_i32_0 : i32, i32
  }
  func.func @transform_2(%arg0: i32) -> (i32, i32) {
    %c0_i32 = arith.constant 0 : i32
    %c0_i32_0 = arith.constant 0 : i32
    %c0_i32_1 = arith.constant 0 : i32
    return %c0_i32, %c0_i32_0 : i32, i32
  }
  func.func @transform_3(%arg0: i32) -> (i32, i32) {
    %c0_i32 = arith.constant 0 : i32
    %c0_i32_0 = arith.constant 0 : i32
    %c0_i32_1 = arith.constant 0 : i32
    return %c0_i32, %c0_i32_0 : i32, i32
  }
  func.func @transform_4(%arg0: i32) -> (i32, i32) {
    %c0_i32 = arith.constant 0 : i32
    %c0_i32_0 = arith.constant 0 : i32
    %c0_i32_1 = arith.constant 0 : i32
    return %c0_i32, %c0_i32_0 : i32, i32
  }
  func.func @transform_5(%arg0: i32) -> (i32, i32) {
    %c0_i32 = arith.constant 0 : i32
    %c0_i32_0 = arith.constant 0 : i32
    %c0_i32_1 = arith.constant 0 : i32
    return %c0_i32, %c0_i32_0 : i32, i32
  }
  func.func @transform_6(%arg0: i32) -> (i32, i32) {
    %c0_i32 = arith.constant 0 : i32
    %c0_i32_0 = arith.constant 0 : i32
    %c0_i32_1 = arith.constant 0 : i32
    return %c0_i32, %c0_i32_0 : i32, i32
  }
  func.func @transform_7(%arg0: i32) -> (i32, i32) {
    %c0_i32 = arith.constant 0 : i32
    %c0_i32_0 = arith.constant 0 : i32
    %c0_i32_1 = arith.constant 0 : i32
    return %c0_i32, %c0_i32_0 : i32, i32
  }
  func.func @transform_8(%arg0: i32) -> (i32, i32) {
    %c0_i32 = arith.constant 0 : i32
    %c0_i32_0 = arith.constant 0 : i32
    %c0_i32_1 = arith.constant 0 : i32
    return %c0_i32, %c0_i32_0 : i32, i32
  }
  func.func @transform_9(%arg0: i32) -> (i32, i32) {
    %c0_i32 = arith.constant 0 : i32
    %c0_i32_0 = arith.constant 0 : i32
    %c0_i32_1 = arith.constant 0 : i32
    return %c0_i32, %c0_i32_0 : i32, i32
  }
  func.func @transform_10(%arg0: i32) -> (i32, i32) {
    %c0_i32 = arith.constant 0 : i32
    %c0_i32_0 = arith.constant 0 : i32
    %c0_i32_1 = arith.constant 0 : i32
    return %c0_i32, %c0_i32_0 : i32, i32
  }
  func.func @transform_11(%arg0: i32) -> (i32, i32) {
    %c0_i32 = arith.constant 0 : i32
    %c0_i32_0 = arith.constant 0 : i32
    %c0_i32_1 = arith.constant 0 : i32
    return %c0_i32, %c0_i32_0 : i32, i32
  }
  func.func @transform_12(%arg0: i32) -> (i32, i32) {
    %c0_i32 = arith.constant 0 : i32
    %c0_i32_0 = arith.constant 0 : i32
    %c0_i32_1 = arith.constant 0 : i32
    return %c0_i32, %c0_i32_0 : i32, i32
  }
  func.func @transform_13(%arg0: i32) -> (i32, i32) {
    %c0_i32 = arith.constant 0 : i32
    %c0_i32_0 = arith.constant 0 : i32
    %c0_i32_1 = arith.constant 0 : i32
    return %c0_i32, %c0_i32_0 : i32, i32
  }
  func.func @transform_14(%arg0: i32) -> (i32, i32) {
    %c0_i32 = arith.constant 0 : i32
    %c0_i32_0 = arith.constant 0 : i32
    return %arg0, %c0_i32 : i32, i32
  }
}

</mosaic_0001>

<bundles_post_ra>
// kernel: tpu_custom_call.1
= control target key start
LH: loop header
LB: loop body
LE: loop exit
PB: predicated region body
PF: predicated region fallthrough
CT: control target
= control target key end

     0   :  { %s1946_s0 = inlined_call_operand.vmem [shape: bf16[16,32], index: 0, kind: input, shape index: {}]   ;;  %s1947_s1 = inlined_call_operand.vmem [shape: f32[32,32], index: 1, kind: input, shape index: {}]   ;;  %s1948_s2 = inlined_call_operand.vmem [shape: f32[1,32], index: 2, kind: input, shape index: {}]   ;;  %s1949_s3 = inlined_call_operand.vmem [shape: f32[8,8], index: 3, kind: input, shape index: {}]   ;;  %s1950_s4 = inlined_call_operand.vmem [shape: f32[8,8], index: 4, kind: input, shape index: {}]   ;;  %s1951_s5 = inlined_call_operand.vmem [shape: f32[8,8], index: 5, kind: input, shape index: {}]   ;;  %s1952_s6 = inlined_call_operand.vmem [shape: f32[8,1], index: 6, kind: input, shape index: {}]   ;;  %s1953_s7 = inlined_call_operand.vmem [shape: f32[32,4], index: 7, kind: input, shape index: {}]   ;;  %s1954_s8 = inlined_call_operand.vmem [shape: f32[32,16], index: 8, kind: input, shape index: {}]   ;;  %s1955_s9 = inlined_call_operand.vmem [shape: f32[32,16], index: 9, kind: input, shape index: {}]   ;;  %s1956_s10 = inlined_call_operand.vmem [shape: f32[4,32], index: 10, kind: input, shape index: {}]   ;;  %s1957_s11 = inlined_call_operand.vmem [shape: f32[1,32], index: 11, kind: input, shape index: {}]   ;;  %s1958_s12 = inlined_call_operand.vmem [shape: f32[16,32], index: 12, kind: input, shape index: {}]   ;;  %s1959_s13 = inlined_call_operand.vmem [shape: f32[1,32], index: 13, kind: input, shape index: {}]   ;;  %s1960_s14 = inlined_call_operand.hbm [shape: bf16[16,32], index: 14, kind: output, shape index: {}]  }
   0x1   :  { %1962 = sst [smem:[#allocation15_spill]] %s1946_s0 }
   0x2   :  { %1963 = sst [smem:[#allocation16_spill]] %s1947_s1 }
   0x3   :  { %1964 = sst [smem:[#allocation17_spill]] %s1949_s3 }
   0x4   :  { %19 = vsyncpa [#allocation11], 0 }
   0x5   :  { %21 = vsyncpa [#allocation11 + $0x1], 0  ;;  %s1643_s29 = smov 0   ;;  %s1645_s30 = smov 0  }
   0x6   :  { %s1647_s15 = smov 0   ;;  %s1649_s16 = smov 0  }
   0x7 LB: > { %1965 = sst [smem:[#allocation13_spill]] %s1557_s15  ;;  %s1664_s17 = sadd.s32 4294967295, %s1561_s16   ;;  %s1561_s16 = sphi %s1649_s16, %s1976_s16   ;;  %s1557_s15 = sphi %s1647_s15, %s1973_s15   ;;  %s1553_s30 = sphi %s1645_s30, %s1975_s30   ;;  %s1549_s29 = sphi %s1643_s29, %s1974_s29  }
   0x8   : > { %s1365_s18 = sadd.s32 4294967294, %s1561_s16   ;;  %s1668_s19 = sadd.s32 1, %s1561_s16  }
   0x9   : > { %s333_s20 = sadd.s32 1, %s1557_s15  ;;  %s330_s21 = ssub.s32 %s1561_s16, %s1668_s19 }
   0xa   : > { %p343_p0 = scmp.ne.s32.totalorder %s1557_s15, %s1553_s30  ;;  %p331_p1 = scmp.eq.s32.totalorder %s330_s21, 0 }
   0xb   : > { %p344_p2 = scmp.eq.s32.totalorder %s1664_s17, 1  ;;  %p349_p3 = scmp.ne.s32.totalorder %s1553_s30, %s1549_s29 }
   0xc   : > { %p350_p4 = scmp.eq.s32.totalorder %s1365_s18, 1  ;;  %p1368_p7 = scmp.ge.s32.totalorder %s1561_s16, 1 }
   0xd   : > { %s1679_s22 = scalar_select %p331_p1, %s1557_s15, %s333_s20  }
   0xe   : > { %p1681_p5 = por %p344_p2, %p343_p0  ;;  %p1685_p6 = por %p350_p4, %p349_p3 }
   0xf   : > { %1966 = sst [smem:[#allocation14_spill]] %s1679_s22  ;;  %p414_p8 = scmp.lt.s32.totalorder %s1561_s16, 3 }
  0x11   : > { %p415_p9 = pnand %p1368_p7, %p414_p8 }
  0x12   : > { %s1969_s1 = sld [smem:[#allocation16_spill]] (!%p415_p9)  ;;  %p459_p10 = scmp.lt.s32.totalorder (!%p415_p9), %s1664_s17, 1 }
  0x13   : > { %418 = sbr.rel (%p415_p9) target bundleno = 1308 (0x51c), region = 76  ;;  %s1970_s0 = sld [smem:[#allocation15_spill]] (!%p415_p9) }
  0x14   : > { %s1565_s25 = smov (!%p415_p9), 127   ;;  %s1971_s3 = sld [smem:[#allocation17_spill]] (!%p415_p9) }
  0x15   : > { %s456_s20 = sand.u32 (!%p415_p9), 1, %s1553_s30  }
  0x18   : > { %v1694_v0 = vld [vmem:[%s1969_s1 + $0x18] sm:$0xff]  ;;  %v1699_v1 = vld [vmem:[%s1969_s1 + $0x10] sm:$0xff]  ;;  %v1706_v2 = vld [vmem:[%s1969_s1 + $0x8] sm:$0xff]  ;;  %s460_s21 = scalar_select %p459_p10, %s1664_s17, 1  ;;  %vm473_vm0 = vcmask 261120   ;;  %vm521_vm5 = vcmask 1047808   ;;  %v518_v28 = vlaneseq }
  0x19   : > { %489 = vmatpush.msra.mxu0 %v1694_v0  ;;  %v1713_v3 = vld [vmem:[%s1969_s1] sm:$0xff]  ;;  %vm542_vm6 = vcmask 64512   ;;  %v1566_v32 = vmov 0   ;;  %v644_v46 = vld [vmem:[%s1953_s7 + $0x18] sm:$0xff]  ;;  %v643_v49 = vld [vmem:[%s1953_s7 + $0x10] sm:$0xff]  ;;  %vm677_vm9 = vcmask 1043456  }
  0x1a   : > { %s1370_s22 = sshll.u32 %s460_s21, 2  ;;  %v1451_v6 = vld [vmem:[%s1948_s2] ss:$0 sm:$0xff]  ;;  %s1563_s21 = smov 32   ;;  %v1728_v29 = vshrl.u32 %v518_v28, 7  ;;  %1439 = vset.pattern.permute.xlu2 %v1566_v32  ;;  %v519_v33 = vand.u32 127, %v518_v28 }
  0x1b   : > { %490 = vmatpush.msra.mxu0 %v1699_v1  ;;  %s1719_s15 = scalar_lea.vmem %s1970_s0, %s1370_s22  ;;  %s1564_s22 = smov 97   ;;  %v539_v30 = vld [vmem:[%s1950_s4] sm:$0xff]  ;;  %v721_v47 = vld [vmem:[%s1954_s8 + $0x18] sm:$0xff]  ;;  %v720_v50 = vld [vmem:[%s1954_s8 + $0x10] sm:$0xff]  ;;  %vm673_vm14 = vcmask 31744   ;;  %vm742_vm15 = vcmask 130048  }
  0x1c   : > { %v463_v4 = vld [vmem:[%s1719_s15] sm:$0xf]  ;;  %1441 = vset.pattern.permute.xlu0 %v1728_v29  ;;  %vm520_vm7 = vcmp.gt.s32.totalorder %v519_v33, 0  ;;  %vm533_vm8 = vcmp.lt.s32.totalorder %v519_v33, 31  ;;  %v747_v48 = vld [vmem:[%s1955_s9 + $0x18] sm:$0xff]  ;;  %v746_v51 = vld [vmem:[%s1955_s9 + $0x10] sm:$0xff] }
  0x1d   : > { %491 = vmatpush.msra.mxu0 %v1706_v2  ;;  %v464_v5 = vunpack.c.l.bf16 %v463_v4  ;;  %v541_v31 = vld [vmem:[%s1952_s6] sm:$0xff]  ;;  %v642_v53 = vld [vmem:[%s1953_s7 + $0x8] sm:$0xff]  ;;  %v1567_v28 = vmov 0.0  }
  0x1e   : > { %615 = vperm.xlu2 %1439, %v541_v31   ;;  %v538_v34 = vld [vmem:[%s1971_s3] sm:$0xff]  ;;  %v719_v54 = vld [vmem:[%s1954_s8 + $0x8] sm:$0xff]  ;;  %770 = vst.msk [vmem:[#allocation8 + $0x8] sm:$0xff] %vm473_vm0, %v1567_v28 }
  0x1f   : > { %492 = vmatpush.msra.mxu0 %v1713_v3  ;;  %v540_v36 = vld [vmem:[%s1951_s5] sm:$0xff]  ;;  %v745_v55 = vld [vmem:[%s1955_s9 + $0x8] sm:$0xff]  ;;  %769 = vst.msk [vmem:[#allocation8] sm:$0xff] %vm473_vm0, %v1567_v28 }
  0x20   : > { %1371 = vmatmul.msk.f32.vlgmr.msra.gmra.mxu0 %vm473_vm0, %v464_v5  ;;  %v641_v56 = vld [vmem:[%s1953_s7] sm:$0xff] }
  0x21   : > { %760 = vmatpush.msrb.mxu0 %v747_v48  ;;  %v718_v57 = vld [vmem:[%s1954_s8] sm:$0xff] }
  0x22   : > { %v744_v58 = vld [vmem:[%s1955_s9] sm:$0xff] }
  0x23   : > { %761 = vmatpush.msrb.mxu0 %v746_v51  ;;  %v668_v59 = vld [vmem:[%s1956_s10] sm:$0xf] }
  0x25   : > { %762 = vmatpush.msrb.mxu0 %v745_v55 }
  0x27   : > { %763 = vmatpush.msrb.mxu0 %v744_v58 }
  0x78   : > { %v616_v42 = vpop.permute.xlu2 %615 }
  0x9d   : > { %v494_v7 = vpop.f32.mrf.mxu0 }
  0x9e   : > { %v495_v8 = vadd.f32 %v1451_v6, %v494_v7 }
  0xa0   : > { %v497_v9 = vsub.f32 0.0, %v495_v8  ;;  %522 = vrot.lane.b32.xlu0 %v495_v8, %s1563_s21  ;;  %561 = vmatpush.msra.mxu1 %v495_v8 }
  0xa1   : > { %1372 = vmatmul.msk.f32.vlgmr.msra.gmra.mxu1 %vm542_vm6, %v539_v30 }
  0xa2   : > { %v498_v10 = vmul.f32 1.442695, %v497_v9  ;;  %660 = vmatpush.msrb.mxu1 %v644_v46 }
  0xa4   : > { %1455 = vpow2.f32 %v498_v10  ;;  %661 = vmatpush.msrb.mxu1 %v643_v49 }
  0xa6   : > { %662 = vmatpush.msrb.mxu1 %v642_v53 }
  0xa8   : > { %663 = vmatpush.msrb.mxu1 %v641_v56 }
  0xaa   : > { %v1456_v11 = vpop.eup %1455 }
  0xab   : > { %v500_v12 = vadd.f32 1.0, %v1456_v11 }
  0xad   : > { %1457 = vrcp.f32 %v500_v12  ;;  %v512_v16 = vand.u32 2147483648, %v500_v12  ;;  %v510_v18 = vand.u32 2147483647, %v500_v12  ;;  %vm506_vm2 = vweird.f32 %v500_v12 }
  0xaf   : > { %v513_v20 = vor.u32 1.1754944e-38, %v512_v16  ;;  %vm511_vm4 = vcmp.eq.f32.partialorder %v510_v18, 8.507059e+37 }
  0xb3   : > { %v1458_v13 = vpop.eup %1457 }
  0xb4   : > { %v502_v14 = vmul.f32 %v1458_v13, %v500_v12  ;;  %vm507_vm1 = vweird.f32 %v1458_v13 }
  0xb5   : > { %vm508_vm3 = vmor %vm506_vm2, %vm507_vm1 }
  0xb6   : > { %v503_v15 = vsub.f32 1.0, %v502_v14  ;;  %v858_v14 = vadd.s32 8, %v1728_v29 }
  0xb8   : > { %v504_v17 = vmul.f32 %v1458_v13, %v503_v15  ;;  %1442 = vset.pattern.permute.xlu1 %v858_v14  ;;  %1440 = vset.pattern.permute.xlu2 %v858_v14 }
  0xba   : > { %v505_v19 = vadd.f32 %v1458_v13, %v504_v17 }
  0xbc   : > { %v509_v21 = vsel %vm508_vm3, %v1458_v13, %v505_v19  ;;  %vm1022_vm3 = vcmask 253952  }
  0xbd   : > { %v514_v22 = vsel %vm511_vm4, %v513_v20, %v509_v21  ;;  %vm1281_vm4 = vcmask 257024  }
  0xbe   : > { %v516_v23 = vmul.f32 %v514_v22, %v495_v8 }
  0xc0   : > { %517 = vst.msk [vmem:[#allocation2] sm:$0xff] %vm473_vm0, %v516_v23 }
 0x112   : > { %v523_v24 = vpop.permute.xlu0 %522 }
 0x113   : > { %v524_v25 = vsel %vm521_vm5, %v523_v24, %v495_v8 }
 0x114   : > { %525 = vrot.lane.b32.xlu0 %v524_v25, %s1563_s21  ;;  %s1369_s21 = sshll.u32 %s456_s20, 2 }
 0x115   : > { %s458_s27 = scalar_lea.vmem [#allocation10], %s1369_s21  ;;  %s1519_s21 = scalar_lea.hbm %s1960_s14, 8 }
 0x116   : > { %s1296_s28 = sshll.u32 %s458_s27, 4  ;;  %s1297_s28 = int_to_ptr.vmem [resolvable:$true] %s1296_s28 }
 0x11e   : > { %v563_v38 = vpop.f32.mrf.mxu1 }
 0x186   : > { %v526_v26 = vpop.permute.xlu0 %525 }
 0x187   : > { %v527_v27 = vsel %vm521_vm5, %v526_v26, %v495_v8 }
 0x188   : > { %529 = vrot.lane.b32.xlu1 %v527_v27, %s1564_s22  ;;  %s1392_s22 = sshll.u32 %s1664_s17, 2  ;;  %s1284_s17 = scalar_lea.sflag [#allocation11], %s456_s20 }
 0x190   : > { %534 = vrot.lane.b32.xlu1 %v527_v27, %s1565_s25  ;;  %v1452_v27 = vld [vmem:[%s1957_s11] ss:$0 sm:$0xff] }
 0x1fa   : > { %v530_v35 = vpop.permute.xlu1 %529 }
 0x1fb   : > { %1373 = vmatpush.msk.msra.mxu2 %vm520_vm7, %v530_v35 }
 0x1fc   : > { %1374 = vmatmul.msk.f32.vlgmr.msra.gmra.mxu2 %vm542_vm6, %v538_v34 }
 0x1fd   : > { %1378 = vmatpush.msk.msrb.mxu2 %vm677_vm9, %v668_v59 }
 0x202   : > { %v535_v37 = vpop.permute.xlu1 %534 }
 0x203   : > { %1375 = vmatpush.msk.msra.mxu3 %vm533_vm8, %v535_v37 }
 0x204   : > { %1376 = vmatmul.msk.f32.vlgmr.msra.gmra.mxu3 %vm542_vm6, %v540_v36 }
 0x205   : > { %734 = vmatpush.msrb.mxu3 %v721_v47  ;;  %v1814_v47 = vld [vmem:[%s1958_s12 + $0x8] sm:$0xff] }
 0x207   : > { %735 = vmatpush.msrb.mxu3 %v720_v50 }
 0x209   : > { %736 = vmatpush.msrb.mxu3 %v719_v54 }
 0x20b   : > { %737 = vmatpush.msrb.mxu3 %v718_v57 }
 0x27f   : > { %v586_v39 = vpop.f32.mrf.mxu2 }
 0x280   : > { %v587_v40 = vadd.f32 %v586_v39, %v563_v38 }
 0x287   : > { %v609_v41 = vpop.f32.mrf.mxu3 }
 0x288   : > { %v612_v43 = vadd.f32 %v609_v41, %v587_v40 }
 0x28a   : > { %v618_v44 = vadd.f32 %v616_v42, %v612_v43 }
 0x28c   : > { %v619_v45 = vsub.f32 0.0, %v618_v44 }
 0x28e   : > { %v620_v52 = vmul.f32 1.442695, %v619_v45 }
 0x290   : > { %1459 = vpow2.f32 %v620_v52 }
 0x296   : > { %v1460_v60 = vpop.eup %1459 }
 0x297   : > { %v622_v61 = vadd.f32 1.0, %v1460_v60  ;;  %v1829_v60 = vld [vmem:[%s1958_s12] sm:$0xff] }
 0x299   : > { %1461 = vrcp.f32 %v622_v61  ;;  %v634_v5 = vand.u32 2147483648, %v622_v61  ;;  %v632_v7 = vand.u32 2147483647, %v622_v61  ;;  %vm628_vm11 = vweird.f32 %v622_v61 }
 0x29b   : > { %v635_v9 = vor.u32 1.1754944e-38, %v634_v5  ;;  %vm633_vm13 = vcmp.eq.f32.partialorder %v632_v7, 8.507059e+37 }
 0x29f   : > { %v1462_v62 = vpop.eup %1461 }
 0x2a0   : > { %v624_v63 = vmul.f32 %v1462_v62, %v622_v61  ;;  %vm629_vm10 = vweird.f32 %v1462_v62 }
 0x2a1   : > { %vm630_vm12 = vmor %vm628_vm11, %vm629_vm10 }
 0x2a2   : > { %v625_v4 = vsub.f32 1.0, %v624_v63 }
 0x2a4   : > { %v626_v6 = vmul.f32 %v1462_v62, %v625_v4 }
 0x2a6   : > { %v627_v8 = vadd.f32 %v1462_v62, %v626_v6 }
 0x2a8   : > { %v631_v10 = vsel %vm630_vm12, %v1462_v62, %v627_v8 }
 0x2a9   : > { %v636_v11 = vsel %vm633_vm13, %v635_v9, %v631_v10 }
 0x2aa   : > { %v638_v12 = vmul.f32 %v636_v11, %v618_v44 }
 0x2ac   : > { %639 = vst.msk [vmem:[#allocation3] sm:$0xff] %vm473_vm0, %v638_v12  ;;  %v994_v12 = vld [vmem:[#allocation8 + $0x8] sm:$0xff] }
 0x2b3   : > { %v1786_v13 = vld [vmem:[#allocation3] sm:$0xff] }
 0x2b4   : > { %1377 = vmatmul.msk.f32.vlgmr.msrb.gmra.mxu1 %vm473_vm0, %v1786_v13  ;;  %1380 = vmatmul.msk.f32.vlgmr.msrb.gmra.mxu3 %vm473_vm0, %v1786_v13 }
 0x2b5   : > { %1381 = vmatmul.msk.f32.vlgmr.msrb.gmra.mxu0 %vm473_vm0, %v1786_v13 }
 0x331   : > { %v665_v15 = vpop.f32.mrf.mxu1 }
 0x332   : > { %v765_v16 = vpop.f32.mrf.mxu0  ;;  %1379 = vmatmul.msk.f32.vlgmr.msrb.gmra.mxu2 %vm673_vm14, %v665_v15 }
 0x333   : > { %768 = vst.msk [vmem:[#allocation7] sm:$0xff] %vm742_vm15, %v765_v16 }
 0x337   : > { %v739_v17 = vpop.f32.mrf.mxu3 }
 0x338   : > { %743 = vst.msk [vmem:[#allocation6] sm:$0xff] %vm742_vm15, %v739_v17 }
 0x33f   : > { %v771_v18 = vld [vmem:[#allocation6] sm:$0xff] }
 0x340   : > { %v862_v19 = vperm.slane %v771_v18, 1  ;;  %v849_v20 = vperm.slane %v771_v18, 0  ;;  %v875_v21 = vperm.slane %v771_v18, 2  ;;  %v888_v22 = vperm.slane %v771_v18, 3 }
 0x341   : > { %v901_v23 = vperm.slane %v771_v18, 4  ;;  %v914_v24 = vperm.slane %v771_v18, 5  ;;  %v927_v25 = vperm.slane %v771_v18, 6  ;;  %v940_v26 = vperm.slane %v771_v18, 7 }
 0x342   : > { %873 = vperm.xlu1 %1442, %v862_v19   ;;  %854 = vperm.xlu0 %1441, %v849_v20  }
 0x343   : > { %860 = vperm.xlu2 %1440, %v849_v20  }
 0x34a   : > { %886 = vperm.xlu1 %1442, %v875_v21   ;;  %1444 = vset.pattern.permute.xlu0 %v858_v14 }
 0x34b   : > { %1443 = vset.pattern.permute.xlu2 %v1728_v29 }
 0x352   : > { %1445 = vset.pattern.permute.xlu1 %v1728_v29  ;;  %899 = vperm.xlu0 %1444, %v888_v22  }
 0x353   : > { %867 = vperm.xlu2 %1443, %v862_v19  }
 0x35a   : > { %893 = vperm.xlu1 %1445, %v888_v22   ;;  %1447 = vset.pattern.permute.xlu0 %v1728_v29 }
 0x35b   : > { %880 = vperm.xlu2 %1443, %v875_v21  }
 0x362   : > { %906 = vperm.xlu1 %1445, %v901_v23   ;;  %919 = vperm.xlu0 %1447, %v914_v24  }
 0x363   : > { %1446 = vset.pattern.permute.xlu2 %v858_v14 }
 0x36a   : > { %1448 = vset.pattern.permute.xlu1 %v858_v14  ;;  %1450 = vset.pattern.permute.xlu0 %v858_v14 }
 0x36b   : > { %912 = vperm.xlu2 %1446, %v901_v23  }
 0x372   : > { %938 = vperm.xlu1 %1448, %v927_v25  }
 0x373   : > { %925 = vperm.xlu2 %1446, %v914_v24  }
 0x37a   : > { %951 = vperm.xlu1 %1448, %v940_v26  }
 0x37b   : > { %1449 = vset.pattern.permute.xlu2 %v1728_v29 }
 0x383   : > { %932 = vperm.xlu2 %1449, %v927_v25  }
 0x38b   : > { %945 = vperm.xlu2 %1449, %v940_v26  }
 0x39d   : > { %v861_v41 = vpop.permute.xlu2 %860 }
 0x3ad   : > { %v1809_v46 = vpop.permute.xlu2 %867 }
 0x3b4   : > { %v874_v44 = vpop.permute.xlu1 %873 }
 0x3b5   : > { %v698_v30 = vpop.f32.mrf.mxu2  ;;  %v1835_v5 = vpop.permute.xlu2 %880 }
 0x3b6   : > { %v699_v31 = vadd.f32 %v1452_v27, %v698_v30  ;;  %v855_v30 = vpop.permute.xlu0 %854 }
 0x3b8   : > { %v702_v32 = vmin.f32 %v699_v31, 20.0  ;;  %vm701_vm2 = vcmp.gt.f32.partialorder %v699_v31, 20.0 }
 0x3ba   : > { %v703_v33 = vmul.f32 1.442695, %v702_v32 }
 0x3bc   : > { %1463 = vpow2.f32 %v703_v33  ;;  %v1822_v53 = vpop.permute.xlu1 %886 }
 0x3c2   : > { %v1464_v34 = vpop.eup %1463 }
 0x3c3   : > { %v705_v35 = vadd.f32 1.0, %v1464_v34  ;;  %v708_v36 = vmul.f32 -0.5, %v1464_v34  ;;  %v711_v37 = vand.u32 2147483647, %v1464_v34 }
 0x3c5   : > { %1465 = vlog2.f32 %v705_v35  ;;  %v709_v29 = vadd.f32 1.0, %v708_v36  ;;  %vm712_vm1 = vcmp.lt.f32.partialorder %v711_v37, 0.0004427343  ;;  %v993_v35 = vld [vmem:[#allocation8] sm:$0xff] }
 0x3c7   : > { %v710_v40 = vmul.f32 %v1464_v34, %v709_v29  ;;  %v1850_v34 = vpop.permute.xlu2 %912 }
 0x3cb   : > { %v1466_v38 = vpop.eup %1465 }
 0x3cc   : > { %v707_v39 = vmul.f32 0.6931472, %v1466_v38  ;;  %v1843_v16 = vpop.permute.xlu1 %893 }
 0x3ce   : > { %v713_v42 = vsel %vm712_vm1, %v710_v40, %v707_v39 }
 0x3cf   : > { %v714_v43 = vsel %vm701_vm2, %v699_v31, %v713_v42 }
 0x3d0   : > { %715 = vst.msk [vmem:[#allocation4] sm:$0xff] %vm473_vm0, %v714_v43  ;;  %v716_v45 = vmul.f32 %v714_v43, %v1786_v13 }
 0x3d2   : > { %717 = vst.msk [vmem:[#allocation5] sm:$0xff] %vm473_vm0, %v716_v45 }
 0x3d7   : > { %v1816_v48 = vld [vmem:[#allocation4] sm:$0xff] }
 0x3d8   : > { %v778_v49 = vrot.slane %v1816_v48, 1  ;;  %v779_v50 = vrot.slane %v1816_v48, 2  ;;  %v785_v51 = vperm.slane %v1816_v48, 0  ;;  %v780_v52 = vrot.slane %v1816_v48, 3 }
 0x3d9   : > { %v1831_v61 = vld [vmem:[#allocation5] sm:$0xff]  ;;  %v781_v4 = vrot.slane %v1816_v48, 4  ;;  %v782_v7 = vrot.slane %v1816_v48, 5  ;;  %v783_v21 = vrot.slane %v1816_v48, 6  ;;  %v784_v40 = vrot.slane %v1816_v48, 7 }
 0x3da   : > { %v786_v54 = vperm.slane %v778_v49, 0  ;;  %v787_v55 = vperm.slane %v779_v50, 0  ;;  %v802_v56 = vmul.f32 %v785_v51, %v1814_v47  ;;  %v788_v59 = vperm.slane %v780_v52, 0 }
 0x3db   : > { %v801_v6 = vmul.f32 %v785_v51, %v1829_v60  ;;  %v954_v8 = vrot.slane %v1831_v61, 1  ;;  %v961_v9 = vperm.slane %v1831_v61, 0  ;;  %v789_v15 = vperm.slane %v781_v4, 0 }
 0x3dc   : > { %v804_v57 = vmul.f32 %v786_v54, %v1814_v47  ;;  %v819_v58 = vmul.f32 1.442695, %v802_v56  ;;  %v806_v62 = vmul.f32 %v787_v55, %v1814_v47  ;;  %v808_v10 = vmul.f32 %v788_v59, %v1814_v47  ;;  %v1855_v56 = vpop.permute.xlu1 %906 }
 0x3dd   : > { %v803_v11 = vmul.f32 %v786_v54, %v1829_v60  ;;  %v817_v17 = vmul.f32 1.442695, %v801_v6  ;;  %v805_v19 = vmul.f32 %v787_v55, %v1829_v60  ;;  %v955_v22 = vrot.slane %v1831_v61, 2 }
 0x3de   : > { %1467 = vpow2.f32 %v819_v58  ;;  %v823_v63 = vmul.f32 1.442695, %v804_v57  ;;  %v827_v14 = vmul.f32 1.442695, %v806_v62  ;;  %v962_v23 = vperm.slane %v954_v8, 0  ;;  %v900_v8 = vpop.permute.xlu0 %899 }
 0x3df   : > { %v821_v20 = vmul.f32 1.442695, %v803_v11  ;;  %v978_v24 = vmul.f32 %v961_v9, %v861_v41  ;;  %v831_v26 = vmul.f32 1.442695, %v808_v10  ;;  %v810_v27 = vmul.f32 %v789_v15, %v1814_v47  ;;  %v1862_v11 = vld [vmem:[#allocation7] sm:$0xff] }
 0x3e0   : > { %1469 = vpow2.f32 %v823_v63  ;;  %v790_v28 = vperm.slane %v782_v7, 0  ;;  %v956_v33 = vrot.slane %v1831_v61, 3  ;;  %v807_v36 = vmul.f32 %v788_v59, %v1829_v60 }
 0x3e1   : > { %1471 = vpow2.f32 %v817_v17  ;;  %v825_v29 = vmul.f32 1.442695, %v805_v19  ;;  %v963_v37 = vperm.slane %v955_v22, 0  ;;  %v980_v38 = vmul.f32 %v962_v23, %v874_v44 }
 0x3e2   : > { %1473 = vpow2.f32 %v827_v14  ;;  %v835_v42 = vmul.f32 1.442695, %v810_v27  ;;  %v812_v43 = vmul.f32 %v790_v28, %v1814_v47  ;;  %v791_v45 = vperm.slane %v783_v21, 0  ;;  %v926_v21 = vpop.permute.xlu2 %925 }
 0x3e3   : > { %1475 = vpow2.f32 %v821_v20  ;;  %v977_v50 = vmul.f32 %v961_v9, %v855_v30  ;;  %v964_v54 = vperm.slane %v956_v33, 0  ;;  %v829_v55 = vmul.f32 1.442695, %v807_v36 }
 0x3e4   : > { %v1468_v18 = vpop.eup %1467  ;;  %1477 = vpow2.f32 %v831_v26  ;;  %v809_v44 = vmul.f32 %v789_v15, %v1829_v60  ;;  %v982_v48 = vmul.f32 %v963_v37, %v1822_v53  ;;  %v957_v58 = vrot.slane %v1831_v61, 4 }
 0x3e5   : > { %v996_v25 = vmul.f32 %v1468_v18, %v994_v12  ;;  %1479 = vpow2.f32 %v825_v29  ;;  %v839_v63 = vmul.f32 1.442695, %v812_v43  ;;  %v814_v4 = vmul.f32 %v791_v45, %v1814_v47 }
 0x3e6   : > { %v1470_v32 = vpop.eup %1469  ;;  %1481 = vpow2.f32 %v835_v42  ;;  %v792_v6 = vperm.slane %v784_v40, 0  ;;  %v979_v9 = vmul.f32 %v962_v23, %v1809_v46  ;;  %v984_v12 = vmul.f32 %v964_v54, %v900_v8 }
 0x3e7   : > { %v998_v31 = vadd.f32 %v996_v25, %v978_v24  ;;  %v1472_v41 = vpop.eup %1471  ;;  %1483 = vpow2.f32 %v829_v55  ;;  %v833_v14 = vmul.f32 1.442695, %v809_v44  ;;  %v811_v15 = vmul.f32 %v790_v28, %v1829_v60 }
 0x3e8   : > { %v995_v51 = vmul.f32 %v1472_v41, %v993_v35  ;;  %v1474_v52 = vpop.eup %1473  ;;  %v965_v18 = vperm.slane %v957_v58, 0  ;;  %v958_v20 = vrot.slane %v1831_v61, 5  ;;  %1485 = vpow2.f32 %v839_v63 }
 0x3e9   : > { %v1025_v39 = vmul.f32 %v1470_v32, %v998_v31  ;;  %1016 = vmatpush.msra.mxu1 %v998_v31  ;;  %v1476_v62 = vpop.eup %1475  ;;  %v843_v22 = vmul.f32 1.442695, %v814_v4  ;;  %v816_v23 = vmul.f32 %v792_v6, %v1814_v47  ;;  %v1028_v24 = vrot.slane %v1862_v11, 1  ;;  %v939_v32 = vpop.permute.xlu1 %938 }
 0x3ea   : > { %v997_v59 = vadd.f32 %v995_v51, %v977_v50  ;;  %v1478_v53 = vpop.eup %1477  ;;  %v981_v25 = vmul.f32 %v963_v37, %v1835_v5  ;;  %1487 = vpow2.f32 %v833_v14  ;;  %v837_v30 = vmul.f32 1.442695, %v811_v15  ;;  %v933_v55 = vpop.permute.xlu2 %932 }
 0x3eb   : > { %v1027_v49 = vadd.f32 %v1025_v39, %v980_v38  ;;  %v1480_v46 = vpop.eup %1479  ;;  %v813_v31 = vmul.f32 %v791_v45, %v1829_v60  ;;  %v986_v33 = vmul.f32 %v965_v18, %v1850_v34  ;;  %v966_v47 = vperm.slane %v958_v20, 0  ;;  %v920_v4 = vpop.permute.xlu0 %919 }
 0x3ec   : > { %v1024_v10 = vmul.f32 %v1476_v62, %v997_v59  ;;  %1017 = vmatpush.msra.mxu1 %v997_v59  ;;  %v1482_v28 = vpop.eup %1481  ;;  %1489 = vpow2.f32 %v843_v22  ;;  %v847_v5 = vmul.f32 1.442695, %v816_v23  ;;  %v1058_v37 = vrot.slane %v1862_v11, 2 }
 0x3ed   : > { %v1055_v57 = vmul.f32 %v1474_v52, %v1027_v49  ;;  %1045 = vmatpush.msra.mxu2 %v1027_v49  ;;  %1382 = vmatmul.msk.f32.vlgmr.msra.gmra.mxu1 %vm742_vm15, %v1862_v11  ;;  %v1484_v29 = vpop.eup %1483  ;;  %v983_v39 = vmul.f32 %v964_v54, %v1843_v16  ;;  %v959_v41 = vrot.slane %v1831_v61, 6  ;;  %1491 = vpow2.f32 %v837_v30 }
 0x3ee   : > { %v1026_v19 = vadd.f32 %v1024_v10, %v979_v9  ;;  %v1486_v42 = vpop.eup %1485  ;;  %v841_v43 = vmul.f32 1.442695, %v813_v31  ;;  %v815_v34 = vmul.f32 %v792_v6, %v1829_v60  ;;  %v988_v49 = vmul.f32 %v966_v47, %v926_v21 }
 0x3ef   : > { %v1057_v7 = vadd.f32 %v1055_v57, %v982_v48  ;;  %v985_v52 = vmul.f32 %v965_v18, %v1855_v56  ;;  %1493 = vpow2.f32 %v847_v5  ;;  %v1088_v16 = vrot.slane %v1862_v11, 3 }
 0x3f0   : > { %v1054_v27 = vmul.f32 %v1480_v46, %v1026_v19  ;;  %1046 = vmatpush.msra.mxu2 %v1026_v19  ;;  %v1488_v51 = vpop.eup %1487  ;;  %v967_v48 = vperm.slane %v959_v41, 0  ;;  %v960_v57 = vrot.slane %v1831_v61, 7  ;;  %1495 = vpow2.f32 %v841_v43 }
 0x3f1   : > { %v1085_v17 = vmul.f32 %v1478_v53, %v1057_v7  ;;  %1075 = vmatpush.msra.mxu3 %v1057_v7  ;;  %1383 = vmatmul.msk.f32.vlgmr.msra.gmra.mxu2 %vm742_vm15, %v1028_v24  ;;  %v845_v58 = vmul.f32 1.442695, %v815_v34  ;;  %v952_v6 = vpop.permute.xlu1 %951  ;;  %v1118_v7 = vrot.slane %v1862_v11, 4  ;;  %v987_v8 = vmul.f32 %v966_v47, %v920_v4 }
 0x3f2   : > { %v1056_v36 = vadd.f32 %v1054_v27, %v981_v25  ;;  %v1490_v60 = vpop.eup %1489  ;;  %v990_v62 = vmul.f32 %v967_v48, %v939_v32  ;;  %v968_v53 = vperm.slane %v960_v57, 0  ;;  %v1148_v18 = vrot.slane %v1862_v11, 5  ;;  %v946_v21 = vpop.permute.xlu2 %945 }
 0x3f3   : > { %v1087_v26 = vadd.f32 %v1085_v17, %v984_v12  ;;  %v1492_v56 = vpop.eup %1491  ;;  %1497 = vpow2.f32 %v845_v58  ;;  %v989_v19 = vmul.f32 %v967_v48, %v933_v55 }
 0x3f4   : > { %v1084_v40 = vmul.f32 %v1484_v29, %v1056_v36  ;;  %1076 = vmatpush.msra.mxu3 %v1056_v36  ;;  %v992_v14 = vmul.f32 %v968_v53, %v952_v6  ;;  %v991_v24 = vmul.f32 %v968_v53, %v946_v21 }
 0x3f5   : > { %v1115_v35 = vmul.f32 %v1482_v28, %v1087_v26  ;;  %1105 = vmatpush.msra.mxu0 %v1087_v26  ;;  %1384 = vmatmul.msk.f32.vlgmr.msra.gmra.mxu3 %vm742_vm15, %v1058_v37  ;;  %v1494_v61 = vpop.eup %1493  ;;  %v1208_v26 = vrot.slane %v1862_v11, 7  ;;  %v1244_v37 = vld [vmem:[#allocation2] sm:$0xff] }
 0x3f6   : > { %v1086_v45 = vadd.f32 %v1084_v40, %v983_v39  ;;  %v1496_v17 = vpop.eup %1495  ;;  %v1454_v40 = vld [vmem:[%s1948_s2] ss:$0 sm:$0xff] }
 0x3f7   : > { %v1117_v38 = vadd.f32 %v1115_v35, %v986_v33  ;;  %v1453_v33 = vld [vmem:[%s1959_s13] ss:$0 sm:$0xff] }
 0x3f8   : > { %v1114_v44 = vmul.f32 %v1488_v51, %v1086_v45  ;;  %1106 = vmatpush.msra.mxu0 %v1086_v45  ;;  %v1246_v35 = vld [vmem:[%s1719_s15] sm:$0xf]  ;;  %v1242_v36 = vmul.f32 %v1453_v33, %v1786_v13  ;;  %s1294_s15 = scalar_lea.hbm %s1960_s14, %s1392_s22 }
 0x3f9   : > { %v1145_v50 = vmul.f32 %v1486_v42, %v1117_v38  ;;  %1135 = vmatpush.msrb.mxu1 %v1117_v38  ;;  %1385 = vmatmul.msk.f32.vlgmr.msra.gmra.mxu0 %vm742_vm15, %v1088_v16  ;;  %v1498_v23 = vpop.eup %1497  ;;  %v1247_v29 = vunpack.c.l.bf16 %v1246_v35  ;;  %s1298_s18 = sshll.u32 %s1294_s15, 4  ;;  %s1299_s18 = int_to_ptr.hbm [resolvable:$true] %s1298_s18 }
 0x3fa   : > { %v1116_v59 = vadd.f32 %v1114_v44, %v985_v52  ;;  %s1513_s3 = sshra.s32 %s1299_s18, 4  ;;  %s1514_s3 = int_to_ptr.hbm [resolvable:$true] %s1513_s3 }
 0x3fb   : > { %v1147_v54 = vadd.f32 %v1145_v50, %v988_v49  ;;  %s1515_s25 = scalar_lea.hbm %s1514_s3, 4  ;;  %p1520_p0 = scmp.lt.s32.totalorder %s1514_s3, %s1960_s14 }
 0x3fc   : > { %v1144_v9 = vmul.f32 %v1492_v56, %v1116_v59  ;;  %1136 = vmatpush.msrb.mxu1 %v1116_v59  ;;  %p1516_p11 = scmp.ne.s32.totalorder %s1514_s3, %s1515_s25  ;;  %p1521_p1 = scmp.lt.s32.totalorder %s1519_s21, %s1515_s25 }
 0x3fd   : > { %v1175_v63 = vmul.f32 %v1490_v60, %v1147_v54  ;;  %1165 = vmatpush.msrb.mxu2 %v1147_v54  ;;  %1386 = vmatmul.msk.f32.vlgmr.msrb.gmra.mxu1 %vm742_vm15, %v1118_v7 }
 0x3fe   : > { %v1146_v12 = vadd.f32 %v1144_v9, %v987_v8  ;;  %1272 = vmatpush.msra.mxu1 %v1694_v0  ;;  %v1178_v0 = vrot.slane %v1862_v11, 6  ;;  %p1517_p12 = pnand %p1516_p11, %p1681_p5  ;;  %p1522_p2 = por %p1521_p1, %p1520_p0 }
 0x3ff   : > { %v1177_v10 = vadd.f32 %v1175_v63, %v990_v62 }
 0x400   : > { %v1174_v20 = vmul.f32 %v1496_v17, %v1146_v12  ;;  %1166 = vmatpush.msrb.mxu2 %v1146_v12  ;;  %1273 = vmatpush.msra.mxu1 %v1699_v1  ;;  %p1518_p13 = pneg %p1517_p12 }
 0x401   : > { %v1205_v15 = vmul.f32 %v1494_v61, %v1177_v10  ;;  %1195 = vmatpush.msrb.mxu3 %v1177_v10  ;;  %1387 = vmatmul.msk.f32.vlgmr.msrb.gmra.mxu2 %vm742_vm15, %v1148_v18 }
 0x402   : > { %v1176_v22 = vadd.f32 %v1174_v20, %v989_v19  ;;  %1274 = vmatpush.msra.mxu1 %v1706_v2  ;;  %p1523_p3 = pnand %p1522_p2, %p1518_p13 }
 0x403   : > { %v1207_v46 = vadd.f32 %v1205_v15, %v992_v14 }
 0x404   : > { %v1204_v25 = vmul.f32 %v1498_v23, %v1176_v22  ;;  %1196 = vmatpush.msrb.mxu3 %v1176_v22  ;;  %1275 = vmatpush.msra.mxu1 %v1713_v3 }
 0x405   : > { %1235 = vst.msk [vmem:[#allocation8 + $0x8] sm:$0xff] %vm473_vm0, %v1207_v46  ;;  %1225 = vmatpush.msrb.mxu0 %v1207_v46  ;;  %1388 = vmatmul.msk.f32.vlgmr.msrb.gmra.mxu3 %vm742_vm15, %v1178_v0 }
 0x406   : > { %v1206_v1 = vadd.f32 %v1204_v25, %v991_v24 }
 0x408   : > { %1234 = vst.msk [vmem:[#allocation8] sm:$0xff] %vm473_vm0, %v1206_v1  ;;  %1226 = vmatpush.msrb.mxu0 %v1206_v1 }
 0x409   : > { %1389 = vmatmul.msk.f32.vlgmr.msrb.gmra.mxu0 %vm742_vm15, %v1208_v26 }
 0x46a   : > { %v1019_v2 = vpop.f32.mrf.mxu1 }
 0x46b   : > { %1023 = vst.msk [vmem:[#allocation9] sm:$0x1] %vm1022_vm3, %v1019_v2 }
 0x474   : > { %v1048_v27 = vpop.f32.mrf.mxu2 }
 0x475   : > { %1053 = vst.msk [vmem:[#allocation9 + $0x1] sm:$0x1] %vm1022_vm3, %v1048_v27 }
 0x476   : > { %v1108_v28 = vpop.f32.mrf.mxu0 }
 0x477   : > { %1113 = vst.msk [vmem:[#allocation9 + $0x3] sm:$0x1] %vm1022_vm3, %v1108_v28 }
 0x478   : > { %v1078_v3 = vpop.f32.mrf.mxu3 }
 0x479   : > { %1083 = vst.msk [vmem:[#allocation9 + $0x2] sm:$0x1] %vm1022_vm3, %v1078_v3 }
 0x47a   : > { %v1138_v11 = vpop.f32.mrf.mxu1 }
 0x47b   : > { %1143 = vst.msk [vmem:[#allocation9 + $0x4] sm:$0x1] %vm1022_vm3, %v1138_v11 }
 0x484   : > { %v1168_v30 = vpop.f32.mrf.mxu2 }
 0x485   : > { %1173 = vst.msk [vmem:[#allocation9 + $0x5] sm:$0x1] %vm1022_vm3, %v1168_v30 }
 0x486   : > { %v1228_v31 = vpop.f32.mrf.mxu0 }
 0x487   : > { %1233 = vst.msk [vmem:[#allocation9 + $0x7] sm:$0x1] %vm1022_vm3, %v1228_v31 }
 0x488   : > { %v1198_v32 = vpop.f32.mrf.mxu3 }
 0x489   : > { %1203 = vst.msk [vmem:[#allocation9 + $0x6] sm:$0x1] %vm1022_vm3, %v1198_v32 }
 0x490   : > { %v1237_v47 = vld [vmem:[#allocation9] sm:$0xff] }
 0x491   : > { %v1243_v5 = vadd.f32 %v1242_v36, %v1237_v47 }
 0x493   : > { %v1245_v38 = vmul.f32 %v1244_v37, %v1243_v5 }
 0x495   : > { %v1248_v39 = vadd.f32 %v1247_v29, %v1245_v38 }
 0x497   : > { %1390 = vmatmul.msk.f32.vlgmr.msra.gmra.mxu1 %vm473_vm0, %v1248_v39 }
 0x514   : > { %v1277_v13 = vpop.f32.mrf.mxu1 }
 0x515   : > { %v1278_v41 = vadd.f32 %v1454_v40, %v1277_v13 }
 0x517   : > { %v1280_v42 = vpack.c.bf16 %v1278_v41, %v1278_v41 }
 0x519   : > { %1282 = vst.msk [vmem:[%s458_s27] sm:$0xf] %vm1281_vm4, %v1280_v42 }
 0x51a   : > { %1526 = shalt.err (!%p1523_p3)
}
 0x51b   : > { %1395 = dma.vmem_to_hbm [thread:$0]  (%p1681_p5), %s1297_s28, 64, %s1299_s18, %s1284_s17  }
 0x51c PF: > { %p1401_p4 = scmp.ge.s32.totalorder %s1561_s16, 2  ;;  %s1310_s20 = sand.u32 1, %s1549_s29  }
 0x51d   : > { %s1311_s15 = scalar_lea.sflag [#allocation11], %s1310_s20 }
 0x51e   : > { %p1398_p7 = pnand %p1401_p4, %p1685_p6 }
 0x520   : > { %p1399_p8 = pneg %p1398_p7 }
 0x522   : > { %1544 = dma.done.wait (%p1399_p8), %s1311_s15, 64  }
 0x523   : > { %1546 = vsyncadd (%p1399_p8), %s1311_s15, 4294967232  ;;  %s1972_s3 = sld [smem:[#allocation13_spill]]  ;;  %p24_p9 = scmp.ge.s32.totalorder %s1668_s19, 4  }
 0x524   : > { %s1973_s15 = sld [smem:[#allocation14_spill]]  ;;  %s1974_s29 = smov %s1553_s30 }
 0x525   : > { %s1976_s16 = smov %s1668_s19  ;;  %26 = sbr.rel (!%p24_p9) target bundleno = 7 (0x7), region = 118 }
 0x529   : > { %s1975_s30 = smov %s1972_s3 }
 0x52a   :  { %1317 = vsyncpa [#allocation11], 1 }
 0x52b   :  { %1319 = vsyncpa [#allocation11 + $0x1], 1 }

</bundles_post_ra>
